<compile_context>
chip_gen: v7x
topology: tpu7x:2x2x1
jax: 0.10.0
libtpu: 0.0.40
codegen_flags: <defaults>
</compile_context>

<pallas_src>
import functools

import jax
import jax.numpy as jnp
from jax.experimental import pallas as pl
from jax.experimental.pallas import tpu as pltpu

HEAD_LANES = 128  # lane-dense fused head width (cls | bbox | cls-for-sigmoid | pad)


def _rpn_kernel(x_ref, w1_ref, b1_ref, wh_ref, bh_ref, out_ref, xpad_ref,
                *, H, W, Cin, A):
    # x_ref   : (1, H, W, Cin)    unpadded NHWC tile for this batch element
    # w1_ref  : (9*Cin, Cout)     folded 3x3 conv weight (tap-major, cin-minor)
    # b1_ref  : (1, Cout)
    # wh_ref  : (Cout, 128)       fused head weight [wc | wb | wc | zeros]
    # bh_ref  : (1, 128)          fused head bias   [bc | bb | bc | zeros]
    # out_ref : (1, H*W, 128)     lane-dense output slab
    # xpad_ref: (H+2, W+2, Cin)   VMEM scratch, zero halo + interior copy

    # In-kernel zero padding of the conv halo (replaces the wrapper-side pad).
    xpad_ref[...] = jnp.zeros_like(xpad_ref)
    xpad_ref[1:H + 1, 1:W + 1, :] = x_ref[0]

    # im2col: concat the 9 shifted views along the channel axis -> (H*W, 9*Cin).
    taps = [xpad_ref[dy:dy + H, dx:dx + W, :].reshape(H * W, Cin)
            for dy in range(3) for dx in range(3)]
    patches = jnp.concatenate(taps, axis=-1)

    # 3x3 conv as a single MXU matmul, then bias + ReLU.
    h = jnp.dot(patches, w1_ref[...], preferred_element_type=jnp.float32)
    h = jnp.maximum(h + b1_ref[...], 0.0)                      # (H*W, Cout)

    # Fused 1x1 heads: one matmul into a 128-lane slab.
    raw = jnp.dot(h, wh_ref[...], preferred_element_type=jnp.float32)
    raw = raw + bh_ref[...]                                    # (H*W, 128)

    # Lanes [5A:6A] hold a duplicate of the score columns; sigmoid them
    # vreg-wide with a lane-select (no masked partial stores).
    lane = jax.lax.broadcasted_iota(jnp.int32, raw.shape, dimension=1)
    out_ref[0] = jnp.where(lane >= 5 * A, jax.nn.sigmoid(raw), raw)


def rpn_forward(feature_map_nchw, params):
    """feature_map_nchw: (B, Cin, H, W) float32. Returns NCHW outputs like PyTorch."""
    w1, b1, wc, bc, wb, bb = (params[k] for k in
                              ("w1", "b1", "wc", "bc", "wb", "bb"))
    B, Cin, H, W = feature_map_nchw.shape
    Cout = w1.shape[-1]
    A = wc.shape[-1]
    assert 6 * A <= HEAD_LANES, "fused head (cls|bbox|cls) must fit 128 lanes"

    # NCHW -> NHWC (pure glue); the conv halo is padded inside the kernel.
    x = jnp.transpose(feature_map_nchw, (0, 2, 3, 1))

    # Fold 3x3 conv weight to a single (9*Cin, Cout) matmul operand
    # (tap order dy-major, dx, then cin — matches the in-kernel concat order).
    w1_fold = w1.reshape(9 * Cin, Cout)
    b1r = b1.reshape(1, Cout)

    # Fuse + lane-pad the two 1x1 heads: [wc | wb | wc] -> (Cout, 128).
    wh = jnp.concatenate([wc, wb, wc], axis=1)
    wh = jnp.pad(wh, ((0, 0), (0, HEAD_LANES - 6 * A)))
    bh = jnp.concatenate([bc, bb, bc])
    bh = jnp.pad(bh, (0, HEAD_LANES - 6 * A)).reshape(1, HEAD_LANES)

    kernel = functools.partial(_rpn_kernel, H=H, W=W, Cin=Cin, A=A)
    full = lambda a: pl.BlockSpec(a.shape, lambda b: (0,) * a.ndim)

    out = pl.pallas_call(
        kernel,
        out_shape=jax.ShapeDtypeStruct((B, H * W, HEAD_LANES), jnp.float32),
        grid_spec=pltpu.PrefetchScalarGridSpec(
            num_scalar_prefetch=0,
            grid=(B,),
            in_specs=[
                pl.BlockSpec((1, H, W, Cin), lambda b: (b, 0, 0, 0)),
                full(w1_fold),   # (9*Cin, Cout)
                full(b1r),       # (1, Cout)
                full(wh),        # (Cout, 128)
                full(bh),        # (1, 128)
            ],
            out_specs=pl.BlockSpec((1, H * W, HEAD_LANES), lambda b: (b, 0, 0)),
            scratch_shapes=[pltpu.VMEM((H + 2, W + 2, Cin), jnp.float32)],
        ),
        compiler_params=pltpu.CompilerParams(
            dimension_semantics=("parallel",)),
    )(x, w1_fold, b1r, wh, bh)

    # Slice the lane-dense slab back into the three module outputs.
    scores = out[:, :, 0:A].reshape(B, H, W, A)
    bbox = out[:, :, A:5 * A].reshape(B, H, W, 4 * A)
    preds = out[:, :, 5 * A:6 * A].reshape(B, H, W, A)

    to_nchw = lambda t: jnp.transpose(t, (0, 3, 1, 2))
    return to_nchw(preds), to_nchw(scores), to_nchw(bbox)


def init_rpn_params(key, input_depth, output_depth, num_anchors):
    """Deterministic synthetic parameter init (shapes per the module __init__)."""
    k1, k2, k3, k4, k5 = jax.random.split(key, 5)
    scale = 0.1
    # conv3x3 -> (kh, kw, Cin, Cout); 1x1 convs -> (Cin, Cout) matmul weights.
    w1 = scale * jax.random.normal(k1, (3, 3, input_depth, output_depth), jnp.float32)
    b1 = scale * jax.random.normal(k2, (output_depth,), jnp.float32)
    wc = scale * jax.random.normal(k3, (output_depth, num_anchors), jnp.float32)
    bc = jnp.ones((num_anchors,), jnp.float32)          # RPN_cls_score.bias = ones
    wb = scale * jax.random.normal(k4, (output_depth, 4 * num_anchors), jnp.float32)
    bb = scale * jax.random.normal(k5, (4 * num_anchors,), jnp.float32)
    return dict(w1=w1, b1=b1, wc=wc, bc=bc, wb=wb, bb=bb)


def _reference_forward(feature_map_nchw, params):
    """Pure-JAX (lax.conv) reference for correctness checking."""
    w1, b1, wc, bc, wb, bb = (params[k] for k in
                              ("w1", "b1", "wc", "bc", "wb", "bb"))
    x = feature_map_nchw
    w1_oihw = jnp.transpose(w1, (3, 2, 0, 1))
    h = jax.lax.conv_general_dilated(x, w1_oihw, (1, 1), ((1, 1), (1, 1)))
    h = jax.nn.relu(h + b1[None, :, None, None])
    wc_oihw = jnp.transpose(wc, (1, 0))[:, :, None, None]
    wb_oihw = jnp.transpose(wb, (1, 0))[:, :, None, None]
    scores = jax.lax.conv_general_dilated(h, wc_oihw, (1, 1), ((0, 0), (0, 0)))
    scores = scores + bc[None, :, None, None]
    bbox = jax.lax.conv_general_dilated(h, wb_oihw, (1, 1), ((0, 0), (0, 0)))
    bbox = bbox + bb[None, :, None, None]
    return jax.nn.sigmoid(scores), scores, bbox


if __name__ == "__main__":
    # Small shapes consistent with the module: batch=2, input_depth=4,
    # spatial=16x16, output_depth=8, 3 ratios x 3 scales -> 9 anchors.
    B, Cin, H, W = 2, 4, 16, 16
    output_depth = 8
    ratios = (0.5, 1.0, 2.0)
    scales = (8.0, 16.0, 32.0)
    num_anchors = len(ratios) * len(scales)

    key = jax.random.PRNGKey(0)
    kx, kp = jax.random.split(key)
    feature_map = jax.random.normal(kx, (B, Cin, H, W), jnp.float32)
    params = init_rpn_params(kp, Cin, output_depth, num_anchors)

    cls_pred, cls_score, bbox_pred = jax.block_until_ready(
        rpn_forward(feature_map, params))

    # Sanity-check against a pure-JAX reference.
    ref_pred, ref_score, ref_bbox = _reference_forward(feature_map, params)
    assert cls_pred.shape == (B, num_anchors, H, W)
    assert cls_score.shape == (B, num_anchors, H, W)
    assert bbox_pred.shape == (B, 4 * num_anchors, H, W)
    assert jnp.allclose(cls_pred, ref_pred, atol=1e-4)
    assert jnp.allclose(cls_score, ref_score, atol=1e-4)
    assert jnp.allclose(bbox_pred, ref_bbox, atol=1e-4)

    print("KERNEL_OK")
</pallas_src>

<mosaic_0001>
module attributes {stable_mosaic.version = 11 : i64} {
  func.func @_rpn_kernel(%arg0: i32, %arg1: memref<1x16x16x4xf32, #tpu.memory_space<vmem>>, %arg2: memref<36x8xf32, #tpu.memory_space<vmem>>, %arg3: memref<1x8xf32, #tpu.memory_space<vmem>>, %arg4: memref<8x128xf32, #tpu.memory_space<vmem>>, %arg5: memref<1x128xf32, #tpu.memory_space<vmem>>, %arg6: memref<1x256x128xf32, #tpu.memory_space<vmem>>, %arg7: memref<18x18x4xf32, #tpu.memory_space<vmem>>) attributes {dimension_semantics = [#tpu.dimension_semantics<parallel>], iteration_bounds = array<i64: 2>, scalar_prefetch = 0 : i64, scratch_operands = 1 : i64, tpu.core_type = #tpu.core_type<tc>, window_params = [{transform_indices = @transform_0, window_bounds = array<i64: 1, 16, 16, 4>}, {pipeline_mode = #tpu.pipeline_mode<synchronous>, transform_indices = @transform_1, window_bounds = array<i64: 36, 8>}, {pipeline_mode = #tpu.pipeline_mode<synchronous>, transform_indices = @transform_2, window_bounds = array<i64: 1, 8>}, {pipeline_mode = #tpu.pipeline_mode<synchronous>, transform_indices = @transform_3, window_bounds = array<i64: 8, 128>}, {pipeline_mode = #tpu.pipeline_mode<synchronous>, transform_indices = @transform_4, window_bounds = array<i64: 1, 128>}, {transform_indices = @transform_5, window_bounds = array<i64: 1, 256, 128>}]} {
    %cst = arith.constant 0.000000e+00 : f32
    %0 = vector.broadcast %cst : f32 to vector<18x18x4xf32>
    %c0 = arith.constant 0 : index
    %c0_0 = arith.constant 0 : index
    %c0_1 = arith.constant 0 : index
    %1 = vector.load %arg7[%c0, %c0_0, %c0_1] : memref<18x18x4xf32, #tpu.memory_space<vmem>>, vector<18x18x4xf32>
    tpu.vector_store %arg7[%c0, %c0_0, %c0_1], %0 {strides = array<i32>} : memref<18x18x4xf32, #tpu.memory_space<vmem>>, vector<18x18x4xf32>,
    %c0_2 = arith.constant 0 : index
    %c0_3 = arith.constant 0 : index
    %c0_4 = arith.constant 0 : index
    %c0_5 = arith.constant 0 : index
    %2 = vector.load %arg1[%c0_2, %c0_3, %c0_4, %c0_5] : memref<1x16x16x4xf32, #tpu.memory_space<vmem>>, vector<1x16x16x4xf32>
    %3 = vector.shape_cast %2 : vector<1x16x16x4xf32> to vector<16x16x4xf32>
    %c1 = arith.constant 1 : index
    %c1_6 = arith.constant 1 : index
    %c0_7 = arith.constant 0 : index
    %4 = vector.load %arg7[%c1, %c1_6, %c0_7] : memref<18x18x4xf32, #tpu.memory_space<vmem>>, vector<16x16x4xf32>
    tpu.vector_store %arg7[%c1, %c1_6, %c0_7], %3 {strides = array<i32>} : memref<18x18x4xf32, #tpu.memory_space<vmem>>, vector<16x16x4xf32>,
    %c0_8 = arith.constant 0 : index
    %c0_9 = arith.constant 0 : index
    %c0_10 = arith.constant 0 : index
    %5 = vector.load %arg7[%c0_8, %c0_9, %c0_10] : memref<18x18x4xf32, #tpu.memory_space<vmem>>, vector<16x16x4xf32>
    %6 = vector.shape_cast %5 : vector<16x16x4xf32> to vector<256x4xf32>
    %c0_11 = arith.constant 0 : index
    %c1_12 = arith.constant 1 : index
    %c0_13 = arith.constant 0 : index
    %7 = vector.load %arg7[%c0_11, %c1_12, %c0_13] : memref<18x18x4xf32, #tpu.memory_space<vmem>>, vector<16x16x4xf32>
    %8 = vector.shape_cast %7 : vector<16x16x4xf32> to vector<256x4xf32>
    %c0_14 = arith.constant 0 : index
    %c2 = arith.constant 2 : index
    %c0_15 = arith.constant 0 : index
    %9 = vector.load %arg7[%c0_14, %c2, %c0_15] : memref<18x18x4xf32, #tpu.memory_space<vmem>>, vector<16x16x4xf32>
    %10 = vector.shape_cast %9 : vector<16x16x4xf32> to vector<256x4xf32>
    %c1_16 = arith.constant 1 : index
    %c0_17 = arith.constant 0 : index
    %c0_18 = arith.constant 0 : index
    %11 = vector.load %arg7[%c1_16, %c0_17, %c0_18] : memref<18x18x4xf32, #tpu.memory_space<vmem>>, vector<16x16x4xf32>
    %12 = vector.shape_cast %11 : vector<16x16x4xf32> to vector<256x4xf32>
    %c1_19 = arith.constant 1 : index
    %c1_20 = arith.constant 1 : index
    %c0_21 = arith.constant 0 : index
    %13 = vector.load %arg7[%c1_19, %c1_20, %c0_21] : memref<18x18x4xf32, #tpu.memory_space<vmem>>, vector<16x16x4xf32>
    %14 = vector.shape_cast %13 : vector<16x16x4xf32> to vector<256x4xf32>
    %c1_22 = arith.constant 1 : index
    %c2_23 = arith.constant 2 : index
    %c0_24 = arith.constant 0 : index
    %15 = vector.load %arg7[%c1_22, %c2_23, %c0_24] : memref<18x18x4xf32, #tpu.memory_space<vmem>>, vector<16x16x4xf32>
    %16 = vector.shape_cast %15 : vector<16x16x4xf32> to vector<256x4xf32>
    %c2_25 = arith.constant 2 : index
    %c0_26 = arith.constant 0 : index
    %c0_27 = arith.constant 0 : index
    %17 = vector.load %arg7[%c2_25, %c0_26, %c0_27] : memref<18x18x4xf32, #tpu.memory_space<vmem>>, vector<16x16x4xf32>
    %18 = vector.shape_cast %17 : vector<16x16x4xf32> to vector<256x4xf32>
    %c2_28 = arith.constant 2 : index
    %c1_29 = arith.constant 1 : index
    %c0_30 = arith.constant 0 : index
    %19 = vector.load %arg7[%c2_28, %c1_29, %c0_30] : memref<18x18x4xf32, #tpu.memory_space<vmem>>, vector<16x16x4xf32>
    %20 = vector.shape_cast %19 : vector<16x16x4xf32> to vector<256x4xf32>
    %c2_31 = arith.constant 2 : index
    %c2_32 = arith.constant 2 : index
    %c0_33 = arith.constant 0 : index
    %21 = vector.load %arg7[%c2_31, %c2_32, %c0_33] : memref<18x18x4xf32, #tpu.memory_space<vmem>>, vector<16x16x4xf32>
    %22 = vector.shape_cast %21 : vector<16x16x4xf32> to vector<256x4xf32>
    %23 = tpu.concatenate %6, %8, %10, %12, %14, %16, %18, %20, %22 in 1 : vector<256x4xf32>, vector<256x4xf32>, vector<256x4xf32>, vector<256x4xf32>, vector<256x4xf32>, vector<256x4xf32>, vector<256x4xf32>, vector<256x4xf32>, vector<256x4xf32> -> vector<256x36xf32>
    %c0_34 = arith.constant 0 : index
    %c0_35 = arith.constant 0 : index
    %24 = vector.load %arg2[%c0_34, %c0_35] : memref<36x8xf32, #tpu.memory_space<vmem>>, vector<36x8xf32>
    %cst_36 = arith.constant dense<0.000000e+00> : vector<256x8xf32>
    %25 = tpu.matmul %23, %24, %cst_36 {dimension_numbers = #tpu.dot_dimension_numbers<[1], [0], [0], [1], [0, 0, 1, 1], [], []>} : vector<256x36xf32>, vector<36x8xf32>, vector<256x8xf32> -> vector<256x8xf32>
    %c0_37 = arith.constant 0 : index
    %c0_38 = arith.constant 0 : index
    %26 = vector.load %arg3[%c0_37, %c0_38] : memref<1x8xf32, #tpu.memory_space<vmem>>, vector<1x8xf32>
    %27 = vector.broadcast %26 : vector<1x8xf32> to vector<256x8xf32>
    %28 = arith.addf %25, %27 : vector<256x8xf32>
    %cst_39 = arith.constant 0.000000e+00 : f32
    %29 = vector.broadcast %cst_39 : f32 to vector<256x8xf32>
    %30 = arith.maximumf %28, %29 : vector<256x8xf32>
    %c0_40 = arith.constant 0 : index
    %c0_41 = arith.constant 0 : index
    %31 = vector.load %arg4[%c0_40, %c0_41] : memref<8x128xf32, #tpu.memory_space<vmem>>, vector<8x128xf32>
    %cst_42 = arith.constant dense<0.000000e+00> : vector<256x128xf32>
    %32 = tpu.matmul %30, %31, %cst_42 {dimension_numbers = #tpu.dot_dimension_numbers<[1], [0], [0], [1], [0, 0, 1, 1], [], []>} : vector<256x8xf32>, vector<8x128xf32>, vector<256x128xf32> -> vector<256x128xf32>
    %c0_43 = arith.constant 0 : index
    %c0_44 = arith.constant 0 : index
    %33 = vector.load %arg5[%c0_43, %c0_44] : memref<1x128xf32, #tpu.memory_space<vmem>>, vector<1x128xf32>
    %34 = vector.broadcast %33 : vector<1x128xf32> to vector<256x128xf32>
    %35 = arith.addf %32, %34 : vector<256x128xf32>
    %36 = tpu.iota {dimensions = array<i32: 1>} : vector<256x128xi32>
    %c45_i32 = arith.constant 45 : i32
    %37 = vector.broadcast %c45_i32 : i32 to vector<256x128xi32>
    %38 = arith.cmpi sge, %36, %37 : vector<256x128xi32>
    %39 = arith.negf %35 : vector<256x128xf32>
    %40 = math.exp %39 : vector<256x128xf32>
    %cst_45 = arith.constant 1.000000e+00 : f32
    %41 = vector.broadcast %cst_45 : f32 to vector<256x128xf32>
    %42 = arith.addf %41, %40 : vector<256x128xf32>
    %43 = arith.divf %41, %42 : vector<256x128xf32>
    %44 = arith.select %38, %43, %35 : vector<256x128xi1>, vector<256x128xf32>
    %c0_46 = arith.constant 0 : index
    %c0_47 = arith.constant 0 : index
    %c0_48 = arith.constant 0 : index
    %45 = vector.load %arg6[%c0_46, %c0_47, %c0_48] : memref<1x256x128xf32, #tpu.memory_space<vmem>>, vector<1x256x128xf32>
    %46 = vector.shape_cast %45 : vector<1x256x128xf32> to vector<256x128xf32>
    %47 = vector.shape_cast %44 : vector<256x128xf32> to vector<1x256x128xf32>
    tpu.vector_store %arg6[%c0_46, %c0_47, %c0_48], %47 {strides = array<i32>} : memref<1x256x128xf32, #tpu.memory_space<vmem>>, vector<1x256x128xf32>,
    return
  }
  func.func @transform_0(%arg0: i32) -> (i32, i32, i32, i32) {
    %c0_i32 = arith.constant 0 : i32
    %c0_i32_0 = arith.constant 0 : i32
    %c0_i32_1 = arith.constant 0 : i32
    %c0_i32_2 = arith.constant 0 : i32
    return %arg0, %c0_i32, %c0_i32_0, %c0_i32_1 : i32, i32, i32, i32
  }
  func.func @transform_1(%arg0: i32) -> (i32, i32) {
    %c0_i32 = arith.constant 0 : i32
    %c0_i32_0 = arith.constant 0 : i32
    %c0_i32_1 = arith.constant 0 : i32
    return %c0_i32, %c0_i32_0 : i32, i32
  }
  func.func @transform_2(%arg0: i32) -> (i32, i32) {
    %c0_i32 = arith.constant 0 : i32
    %c0_i32_0 = arith.constant 0 : i32
    %c0_i32_1 = arith.constant 0 : i32
    return %c0_i32, %c0_i32_0 : i32, i32
  }
  func.func @transform_3(%arg0: i32) -> (i32, i32) {
    %c0_i32 = arith.constant 0 : i32
    %c0_i32_0 = arith.constant 0 : i32
    %c0_i32_1 = arith.constant 0 : i32
    return %c0_i32, %c0_i32_0 : i32, i32
  }
  func.func @transform_4(%arg0: i32) -> (i32, i32) {
    %c0_i32 = arith.constant 0 : i32
    %c0_i32_0 = arith.constant 0 : i32
    %c0_i32_1 = arith.constant 0 : i32
    return %c0_i32, %c0_i32_0 : i32, i32
  }
  func.func @transform_5(%arg0: i32) -> (i32, i32, i32) {
    %c0_i32 = arith.constant 0 : i32
    %c0_i32_0 = arith.constant 0 : i32
    %c0_i32_1 = arith.constant 0 : i32
    return %arg0, %c0_i32, %c0_i32_0 : i32, i32, i32
  }
}

</mosaic_0001>

<bundles_post_ra>
// kernel: tpu_custom_call.1
= control target key start
LH: loop header
LB: loop body
LE: loop exit
PB: predicated region body
PF: predicated region fallthrough
CT: control target
= control target key end

     0   :  { %10 = vsyncpa [#allocation4], 0  ;;  %s4986_s0 = inlined_call_operand.vmem [shape: f32[2,16,16,4], index: 0, kind: input, shape index: {}]   ;;  %s4987_s1 = inlined_call_operand.vmem [shape: f32[36,8], index: 1, kind: input, shape index: {}]   ;;  %s4988_s2 = inlined_call_operand.vmem [shape: f32[1,8], index: 2, kind: input, shape index: {}]   ;;  %s4989_s3 = inlined_call_operand.vmem [shape: f32[8,128], index: 3, kind: input, shape index: {}]   ;;  %s4990_s4 = inlined_call_operand.vmem [shape: f32[1,128], index: 4, kind: input, shape index: {}]   ;;  %s4991_s5 = inlined_call_operand.hbm [shape: f32[2,256,128], index: 5, kind: output, shape index: {}]  }
   0x1   :  { %12 = vsyncpa [#allocation4 + $0x1], 0  ;;  %s3536_s18 = smov 0   ;;  %s3538_s19 = smov 0  }
   0x2   :  { %s3540_s20 = smov 0   ;;  %s3542_s21 = smov 0  }
   0x3 LB: > { %s3557_s22 = sadd.s32 4294967295, %s3493_s21   ;;  %s2954_s23 = sadd.s32 4294967294, %s3493_s21   ;;  %s3493_s21 = sphi %s3542_s21, %s4997_s21   ;;  %s3489_s20 = sphi %s3540_s20, %s4996_s20   ;;  %s3485_s19 = sphi %s3538_s19, %s4995_s19   ;;  %s3481_s18 = sphi %s3536_s18, %s4994_s18  }
   0x4   : > { %s3561_s24 = sadd.s32 1, %s3493_s21   ;;  %s135_s25 = sadd.s32 1, %s3489_s20 }
   0x5   : > { %s132_s26 = ssub.s32 %s3493_s21, %s3561_s24  ;;  %p145_p0 = scmp.ne.s32.totalorder %s3489_s20, %s3485_s19 }
   0x6   : > { %p133_p1 = scmp.eq.s32.totalorder %s132_s26, 0  ;;  %p146_p2 = scmp.eq.s32.totalorder %s3557_s22, 1 }
   0x7   : > { %p151_p3 = scmp.ne.s32.totalorder %s3485_s19, %s3481_s18  ;;  %p152_p4 = scmp.eq.s32.totalorder %s2954_s23, 1 }
   0x8   : > { %s3572_s27 = scalar_select %p133_p1, %s3489_s20, %s135_s25  }
   0x9   : > { %p3574_p5 = por %p146_p2, %p145_p0  ;;  %p3578_p6 = por %p152_p4, %p151_p3 }
   0xa   : > { %p2957_p7 = scmp.ge.s32.totalorder %s3493_s21, 1  ;;  %p190_p8 = scmp.lt.s32.totalorder %s3493_s21, 3 }
   0xc   : > { %p191_p9 = pnand %p2957_p7, %p190_p8 }
   0xd   : > { %vm223_vm0 = vcmask (!%p191_p9), 31744   ;;  %vm226_vm1 = vcmask (!%p191_p9), 25600   ;;  %v3495_v0 = vmov (!%p191_p9), 0.0   ;;  %p218_p10 = scmp.lt.s32.totalorder (!%p191_p9), %s3557_s22, 1  ;;  %s3496_s10 = smov (!%p191_p9), 8   ;;  %v1920_v23 = vld [vmem:[%s4987_s1] sm:$0xff] (!%p191_p9) }
   0xe   : > { %194 = sbr.rel (%p191_p9) target bundleno = 1143 (0x477), region = 40  ;;  %224 = vst.msk [vmem:[#allocation2] sm:$0xff] (!%p191_p9), %vm223_vm0, %v3495_v0  ;;  %225 = vst.msk [vmem:[#allocation2 + $0x8] sm:$0xff] (!%p191_p9), %vm223_vm0, %v3495_v0  ;;  %s3497_s11 = smov (!%p191_p9), 4   ;;  %v1921_v24 = vld [vmem:[%s4987_s1 + $0x8] sm:$0xff] (!%p191_p9)  ;;  %v1922_v27 = vld [vmem:[%s4987_s1 + $0x10] sm:$0xff] (!%p191_p9) }
   0xf   : > { %228 = vst.msk [vmem:[#allocation2 + $0x18] sm:$0xff] (!%p191_p9), %vm223_vm0, %v3495_v0  ;;  %229 = vst.msk [vmem:[#allocation2 + $0x20] sm:$0xff] (!%p191_p9), %vm223_vm0, %v3495_v0  ;;  %s3498_s12 = smov (!%p191_p9), 12   ;;  %s3499_s13 = smov (!%p191_p9), 16   ;;  %v3245_v25 = vpack.c.bf16 (!%p191_p9), %v1921_v24, %v1920_v23  ;;  %v1923_v28 = vld [vmem:[%s4987_s1 + $0x18] sm:$0xff] (!%p191_p9)  ;;  %vm2029_vm2 = vcmask (!%p191_p9), 1043456  }
  0x10   : > { %231 = vst.msk [vmem:[#allocation2 + $0x30] sm:$0xff] (!%p191_p9), %vm223_vm0, %v3495_v0  ;;  %232 = vst.msk [vmem:[#allocation2 + $0x38] sm:$0xff] (!%p191_p9), %vm223_vm0, %v3495_v0  ;;  %s3500_s14 = smov (!%p191_p9), 20   ;;  %s3501_s25 = smov (!%p191_p9), 24   ;;  %v3249_v31 = vpack.c.bf16 (!%p191_p9), %v1923_v28, %v1922_v27  ;;  %v1924_v32 = vld [vmem:[%s4987_s1 + $0x20] sm:$0xf] (!%p191_p9) }
  0x11   : > { %234 = vst.msk [vmem:[#allocation2 + $0x48] sm:$0xff] (!%p191_p9), %vm223_vm0, %v3495_v0  ;;  %235 = vst.msk [vmem:[#allocation2 + $0x50] sm:$0xff] (!%p191_p9), %vm223_vm0, %v3495_v0  ;;  %3246 = vmatprep.subr.bf16.mxu0 (!%p191_p9), %v3245_v25  ;;  %s3502_s8 = smov (!%p191_p9), 28   ;;  %s3503_s17 = smov (!%p191_p9), 32   ;;  %vm1689_vm3 = vcmask (!%p191_p9), 64512   ;;  %vm1722_vm4 = vcmask (!%p191_p9), 97280  }
  0x12   : > { %237 = vst.msk [vmem:[#allocation2 + $0x60] sm:$0xff] (!%p191_p9), %vm223_vm0, %v3495_v0  ;;  %238 = vst.msk [vmem:[#allocation2 + $0x68] sm:$0xff] (!%p191_p9), %vm223_vm0, %v3495_v0  ;;  %3248 = vmatpush3.bf16.msra.mxu0 (!%p191_p9), %v3245_v25  ;;  %vm1755_vm5 = vcmask (!%p191_p9), 130048   ;;  %vm1788_vm6 = vcmask (!%p191_p9), 162816   ;;  %vm1821_vm7 = vcmask (!%p191_p9), 195584   ;;  %vm1854_vm8 = vcmask (!%p191_p9), 228352  }
  0x13   : > { %240 = vst.msk [vmem:[#allocation2 + $0x78] sm:$0xff] (!%p191_p9), %vm223_vm0, %v3495_v0  ;;  %241 = vst.msk [vmem:[#allocation2 + $0x80] sm:$0xff] (!%p191_p9), %vm223_vm0, %v3495_v0  ;;  %3250 = vmatprep.subr.bf16.mxu0 (!%p191_p9), %v3249_v31  ;;  %vm1887_vm9 = vcmask (!%p191_p9), 261120   ;;  %vm1932_vm10 = vcmask (!%p191_p9), 293888  }
  0x14   : > { %243 = vst.msk [vmem:[#allocation2 + $0x90] sm:$0xff] (!%p191_p9), %vm223_vm0, %v3495_v0  ;;  %244 = vst.msk [vmem:[#allocation2 + $0x98] sm:$0xff] (!%p191_p9), %vm223_vm0, %v3495_v0 }
  0x15   : > { %246 = vst.msk [vmem:[#allocation2 + $0xa8] sm:$0xff] %vm223_vm0, %v3495_v0  ;;  %247 = vst.msk [vmem:[#allocation2 + $0xb0] sm:$0xff] %vm223_vm0, %v3495_v0  ;;  %s219_s30 = scalar_select %p218_p10, %s3557_s22, 1  ;;  %v408_v4 = vld [vmem:[#allocation2 + $0x2] sm:$0xff] }
  0x16   : > { %249 = vst.msk [vmem:[#allocation2 + $0xc0] sm:$0xff] %vm223_vm0, %v3495_v0  ;;  %250 = vst.msk [vmem:[#allocation2 + $0xc8] sm:$0xff] %vm223_vm0, %v3495_v0  ;;  %v376_v5 = vld [vmem:[#allocation2 + $0x1] sm:$0xff]  ;;  %793 = vrot.lane.b32.xlu1 %v408_v4, %s3496_s10  ;;  %3252 = vmatpush3.bf16.msra.mxu0 %v3249_v31 }
  0x17   : > { %252 = vst.msk [vmem:[#allocation2 + $0xd8] sm:$0xff] %vm223_vm0, %v3495_v0  ;;  %253 = vst.msk [vmem:[#allocation2 + $0xe0] sm:$0xff] %vm223_vm0, %v3495_v0  ;;  %s3065_s6 = sshll.u32 %s219_s30, 8  ;;  %665 = vrot.lane.b32.xlu0 %v376_v5, %s3497_s11  ;;  %3145 = vmatprep.subr.msk.mxu0 %vm2029_vm2, %v1924_v32  ;;  %v345_v25 = vld [vmem:[#allocation2 + $0x8] sm:$0xff] }
  0x18   : > { %255 = vst.msk [vmem:[#allocation2 + $0xf0] sm:$0xff] %vm223_vm0, %v3495_v0  ;;  %256 = vst.msk [vmem:[#allocation2 + $0xf8] sm:$0xff] %vm223_vm0, %v3495_v0  ;;  %s3643_s9 = scalar_lea.vmem %s4986_s0, %s3065_s6 }
  0x19   : > { %258 = vst.msk [vmem:[#allocation2 + $0x108] sm:$0xff] %vm223_vm0, %v3495_v0  ;;  %259 = vst.msk [vmem:[#allocation2 + $0x110] sm:$0xff] %vm223_vm0, %v3495_v0  ;;  %v279_v1 = vld [vmem:[%s3643_s9] sm:$0xff]  ;;  %v280_v2 = vld [vmem:[%s3643_s9 + $0x8] sm:$0xff] }
  0x1a   : > { %261 = vst.msk [vmem:[#allocation2 + $0x120] sm:$0xff] %vm223_vm0, %v3495_v0  ;;  %262 = vst.msk [vmem:[#allocation2 + $0x128] sm:$0xff] %vm223_vm0, %v3495_v0  ;;  %v281_v3 = vld [vmem:[%s3643_s9 + $0x10] sm:$0xff]  ;;  %v282_v8 = vld [vmem:[%s3643_s9 + $0x18] sm:$0xff]  ;;  %3146 = vmatpush3.msk.msra.mxu0 %vm2029_vm2, %v1924_v32 }
  0x1b   : > { %264 = vst.msk [vmem:[#allocation2 + $0x138] sm:$0xff] %vm223_vm0, %v3495_v0  ;;  %265 = vst.msk [vmem:[#allocation2 + $0x140] sm:$0xff] %vm223_vm0, %v3495_v0  ;;  %v283_v9 = vld [vmem:[%s3643_s9 + $0x20] sm:$0xff]  ;;  %v284_v10 = vld [vmem:[%s3643_s9 + $0x28] sm:$0xff] }
  0x1c   : > { %267 = vst.msk [vmem:[#allocation2 + $0x150] sm:$0xff] %vm223_vm0, %v3495_v0  ;;  %268 = vst.msk [vmem:[#allocation2 + $0x158] sm:$0xff] %vm223_vm0, %v3495_v0  ;;  %v285_v11 = vld [vmem:[%s3643_s9 + $0x30] sm:$0xff]  ;;  %v286_v12 = vld [vmem:[%s3643_s9 + $0x38] sm:$0xff] }
  0x1d   : > { %270 = vst.msk [vmem:[#allocation2 + $0x168] sm:$0xff] %vm223_vm0, %v3495_v0  ;;  %271 = vst.msk [vmem:[#allocation2 + $0x170] sm:$0xff] %vm223_vm0, %v3495_v0  ;;  %v287_v13 = vld [vmem:[%s3643_s9 + $0x40] sm:$0xff]  ;;  %v288_v14 = vld [vmem:[%s3643_s9 + $0x48] sm:$0xff] }
  0x1e   : > { %273 = vst.msk [vmem:[#allocation2 + $0x180] sm:$0xff] %vm223_vm0, %v3495_v0  ;;  %274 = vst.msk [vmem:[#allocation2 + $0x188] sm:$0xff] %vm223_vm0, %v3495_v0  ;;  %v289_v20 = vld [vmem:[%s3643_s9 + $0x50] sm:$0xff]  ;;  %v290_v26 = vld [vmem:[%s3643_s9 + $0x58] sm:$0xff] }
  0x1f   : > { %276 = vst.msk [vmem:[#allocation2 + $0x198] sm:$0xff] %vm223_vm0, %v3495_v0  ;;  %277 = vst.msk [vmem:[#allocation2 + $0x1a0] sm:$0xff] %vm223_vm0, %v3495_v0  ;;  %v291_v36 = vld [vmem:[%s3643_s9 + $0x60] sm:$0xff]  ;;  %v292_v38 = vld [vmem:[%s3643_s9 + $0x68] sm:$0xff] }
  0x20   : > { %227 = vst.msk [vmem:[#allocation2 + $0x10] sm:$0x3] %vm226_vm1, %v3495_v0  ;;  %230 = vst.msk [vmem:[#allocation2 + $0x28] sm:$0x3] %vm226_vm1, %v3495_v0  ;;  %v293_v44 = vld [vmem:[%s3643_s9 + $0x70] sm:$0xff]  ;;  %v294_v46 = vld [vmem:[%s3643_s9 + $0x78] sm:$0xff] }
  0x21   : > { %233 = vst.msk [vmem:[#allocation2 + $0x40] sm:$0x3] %vm226_vm1, %v3495_v0  ;;  %236 = vst.msk [vmem:[#allocation2 + $0x58] sm:$0x3] %vm226_vm1, %v3495_v0  ;;  %v295_v52 = vld [vmem:[%s3643_s9 + $0x80] sm:$0xff]  ;;  %v296_v58 = vld [vmem:[%s3643_s9 + $0x88] sm:$0xff] }
  0x22   : > { %239 = vst.msk [vmem:[#allocation2 + $0x70] sm:$0x3] %vm226_vm1, %v3495_v0  ;;  %242 = vst.msk [vmem:[#allocation2 + $0x88] sm:$0x3] %vm226_vm1, %v3495_v0  ;;  %v298_v28 = vld [vmem:[%s3643_s9 + $0x98] sm:$0xff] }
  0x23   : > { %245 = vst.msk [vmem:[#allocation2 + $0xa0] sm:$0x3] %vm226_vm1, %v3495_v0  ;;  %248 = vst.msk [vmem:[#allocation2 + $0xb8] sm:$0x3] %vm226_vm1, %v3495_v0 }
  0x24   : > { %251 = vst.msk [vmem:[#allocation2 + $0xd0] sm:$0x3] %vm226_vm1, %v3495_v0  ;;  %254 = vst.msk [vmem:[#allocation2 + $0xe8] sm:$0x3] %vm226_vm1, %v3495_v0 }
  0x25   : > { %257 = vst.msk [vmem:[#allocation2 + $0x100] sm:$0x3] %vm226_vm1, %v3495_v0  ;;  %260 = vst.msk [vmem:[#allocation2 + $0x118] sm:$0x3] %vm226_vm1, %v3495_v0 }
  0x26   : > { %263 = vst.msk [vmem:[#allocation2 + $0x130] sm:$0x3] %vm226_vm1, %v3495_v0  ;;  %266 = vst.msk [vmem:[#allocation2 + $0x148] sm:$0x3] %vm226_vm1, %v3495_v0 }
  0x27   : > { %269 = vst.msk [vmem:[#allocation2 + $0x160] sm:$0x3] %vm226_vm1, %v3495_v0  ;;  %272 = vst.msk [vmem:[#allocation2 + $0x178] sm:$0x3] %vm226_vm1, %v3495_v0  ;;  %v409_v6 = vld [vmem:[#allocation2 + $0xa] sm:$0xff] }
  0x28   : > { %275 = vst.msk [vmem:[#allocation2 + $0x190] sm:$0x3] %vm226_vm1, %v3495_v0  ;;  %278 = vst.msk [vmem:[#allocation2 + $0x1a8] sm:$0x3] %vm226_vm1, %v3495_v0  ;;  %v377_v7 = vld [vmem:[#allocation2 + $0x9] sm:$0xff]  ;;  %795 = vrot.lane.b32.xlu1 %v409_v6, %s3496_s10 }
  0x29   : > { %312 = vst.msk [vmem:[#allocation2 + $0x19] sm:$0xff] %vm223_vm0, %v279_v1  ;;  %313 = vst.msk [vmem:[#allocation2 + $0x21] sm:$0xff] %vm223_vm0, %v280_v2  ;;  %667 = vrot.lane.b32.xlu0 %v377_v7, %s3497_s11 }
  0x2a   : > { %314 = vst.msk [vmem:[#allocation2 + $0x31] sm:$0xff] %vm223_vm0, %v281_v3  ;;  %315 = vst.msk [vmem:[#allocation2 + $0x39] sm:$0xff] %vm223_vm0, %v282_v8 }
  0x2b   : > { %316 = vst.msk [vmem:[#allocation2 + $0x49] sm:$0xff] %vm223_vm0, %v283_v9  ;;  %317 = vst.msk [vmem:[#allocation2 + $0x51] sm:$0xff] %vm223_vm0, %v284_v10 }
  0x2c   : > { %318 = vst.msk [vmem:[#allocation2 + $0x61] sm:$0xff] %vm223_vm0, %v285_v11  ;;  %319 = vst.msk [vmem:[#allocation2 + $0x69] sm:$0xff] %vm223_vm0, %v286_v12  ;;  %v344_v12 = vld [vmem:[#allocation2] sm:$0xff] }
  0x2d   : > { %320 = vst.msk [vmem:[#allocation2 + $0x79] sm:$0xff] %vm223_vm0, %v287_v13  ;;  %321 = vst.msk [vmem:[#allocation2 + $0x81] sm:$0xff] %vm223_vm0, %v288_v14  ;;  %v297_v13 = vld [vmem:[%s3643_s9 + $0x90] sm:$0xff] }
  0x2e   : > { %322 = vst.msk [vmem:[#allocation2 + $0x91] sm:$0xff] %vm223_vm0, %v289_v20  ;;  %323 = vst.msk [vmem:[#allocation2 + $0x99] sm:$0xff] %vm223_vm0, %v290_v26 }
  0x2f   : > { %324 = vst.msk [vmem:[#allocation2 + $0xa9] sm:$0xff] %vm223_vm0, %v291_v36  ;;  %325 = vst.msk [vmem:[#allocation2 + $0xb1] sm:$0xff] %vm223_vm0, %v292_v38 }
  0x30   : > { %v3669_v15 = vld [vmem:[#allocation2 + $0x20] sm:$0xff]  ;;  %v3671_v16 = vld [vmem:[#allocation2 + $0x18] sm:$0xff]  ;;  %326 = vst.msk [vmem:[#allocation2 + $0xc1] sm:$0xff] %vm223_vm0, %v293_v44  ;;  %327 = vst.msk [vmem:[#allocation2 + $0xc9] sm:$0xff] %vm223_vm0, %v294_v46 }
  0x31   : > { %923 = vrot.lane.b32.xlu1 %v3669_v15, %s3498_s12  ;;  %921 = vrot.lane.b32.xlu0 %v3671_v16, %s3498_s12  ;;  %v472_v17 = vld [vmem:[#allocation2 + $0x19] sm:$0xff]  ;;  %v473_v18 = vld [vmem:[#allocation2 + $0x21] sm:$0xff]  ;;  %v3685_v22 = vld [vmem:[#allocation2 + $0x30] sm:$0xff]  ;;  %328 = vst.msk [vmem:[#allocation2 + $0xd9] sm:$0xff] %vm223_vm0, %v295_v52 }
  0x32   : > { %v504_v19 = vld [vmem:[#allocation2 + $0x1a] sm:$0xff]  ;;  %v505_v21 = vld [vmem:[#allocation2 + $0x22] sm:$0xff]  ;;  %v569_v30 = vld [vmem:[#allocation2 + $0x31] sm:$0xff]  ;;  %329 = vst.msk [vmem:[#allocation2 + $0xe1] sm:$0xff] %vm223_vm0, %v296_v58 }
  0x33   : > { %v3707_v29 = vld [vmem:[#allocation2 + $0x38] sm:$0xff]  ;;  %v3728_v37 = vld [vmem:[#allocation2 + $0x48] sm:$0xff]  ;;  %v3738_v39 = vld [vmem:[#allocation2 + $0x50] sm:$0xff]  ;;  %330 = vst.msk [vmem:[#allocation2 + $0xf1] sm:$0xff] %vm223_vm0, %v297_v13 }
  0x34   : > { %v570_v33 = vld [vmem:[#allocation2 + $0x39] sm:$0xff]  ;;  %v571_v40 = vld [vmem:[#allocation2 + $0x49] sm:$0xff]  ;;  %v572_v41 = vld [vmem:[#allocation2 + $0x51] sm:$0xff]  ;;  %331 = vst.msk [vmem:[#allocation2 + $0xf9] sm:$0xff] %vm223_vm0, %v298_v28 }
  0x35   : > { %1049 = vrot.lane.b32.xlu0 %v472_v17, %s3499_s13  ;;  %669 = vrot.lane.b32.xlu1 %v472_v17, %s3497_s11  ;;  %v601_v34 = vld [vmem:[#allocation2 + $0x32] sm:$0xff]  ;;  %v602_v35 = vld [vmem:[#allocation2 + $0x3a] sm:$0xff]  ;;  %v603_v42 = vld [vmem:[#allocation2 + $0x4a] sm:$0xff] }
  0x36   : > { %v604_v43 = vld [vmem:[#allocation2 + $0x52] sm:$0xff]  ;;  %v3756_v45 = vld [vmem:[#allocation2 + $0x60] sm:$0xff]  ;;  %v3766_v47 = vld [vmem:[#allocation2 + $0x68] sm:$0xff] }
  0x37   : > { %v573_v48 = vld [vmem:[#allocation2 + $0x61] sm:$0xff]  ;;  %v574_v49 = vld [vmem:[#allocation2 + $0x69] sm:$0xff]  ;;  %v3784_v55 = vld [vmem:[#allocation2 + $0x78] sm:$0xff] }
  0x38   : > { %v605_v50 = vld [vmem:[#allocation2 + $0x62] sm:$0xff]  ;;  %v606_v51 = vld [vmem:[#allocation2 + $0x6a] sm:$0xff]  ;;  %v575_v62 = vld [vmem:[#allocation2 + $0x79] sm:$0xff] }
  0x39   : > { %1051 = vrot.lane.b32.xlu0 %v473_v18, %s3499_s13  ;;  %1177 = vrot.lane.b32.xlu1 %v504_v19, %s3500_s14  ;;  %v3800_v61 = vld [vmem:[#allocation2 + $0x80] sm:$0xff]  ;;  %v3832_v20 = vld [vmem:[#allocation2 + $0x90] sm:$0xff]  ;;  %v3857_v38 = vld [vmem:[#allocation2 + $0x98] sm:$0xff] }
  0x3a   : > { %v576_v3 = vld [vmem:[#allocation2 + $0x81] sm:$0xff] }
  0x3b   : > { %v607_v4 = vld [vmem:[#allocation2 + $0x7a] sm:$0xff]  ;;  %v608_v9 = vld [vmem:[#allocation2 + $0x82] sm:$0xff] }
  0x3d   : > { %671 = vrot.lane.b32.xlu0 %v473_v18, %s3497_s11  ;;  %797 = vrot.lane.b32.xlu1 %v504_v19, %s3496_s10 }
  0x41   : > { %1179 = vrot.lane.b32.xlu0 %v505_v21, %s3500_s14  ;;  %1305 = vrot.lane.b32.xlu1 %v3685_v22, %s3501_s25 }
  0x45   : > { %799 = vrot.lane.b32.xlu0 %v505_v21, %s3496_s10  ;;  %925 = vrot.lane.b32.xlu1 %v3685_v22, %s3498_s12 }
  0x49   : > { %1307 = vrot.lane.b32.xlu0 %v3707_v29, %s3501_s25  ;;  %1433 = vrot.lane.b32.xlu1 %v569_v30, %s3502_s8 }
  0x4d   : > { %927 = vrot.lane.b32.xlu0 %v3707_v29, %s3498_s12  ;;  %1053 = vrot.lane.b32.xlu1 %v569_v30, %s3499_s13 }
  0x51   : > { %1435 = vrot.lane.b32.xlu0 %v570_v33, %s3502_s8  ;;  %1561 = vrot.lane.b32.xlu1 %v601_v34, %s3503_s17 }
  0x55   : > { %673 = vrot.lane.b32.xlu0 %v569_v30, %s3497_s11  ;;  %1055 = vrot.lane.b32.xlu1 %v570_v33, %s3499_s13 }
  0x59   : > { %1181 = vrot.lane.b32.xlu0 %v601_v34, %s3500_s14  ;;  %1563 = vrot.lane.b32.xlu1 %v602_v35, %s3503_s17 }
  0x5d   : > { %675 = vrot.lane.b32.xlu0 %v570_v33, %s3497_s11  ;;  %801 = vrot.lane.b32.xlu1 %v601_v34, %s3496_s10 }
  0x61   : > { %1183 = vrot.lane.b32.xlu0 %v602_v35, %s3500_s14  ;;  %1309 = vrot.lane.b32.xlu1 %v3728_v37, %s3501_s25 }
  0x65   : > { %803 = vrot.lane.b32.xlu0 %v602_v35, %s3496_s10  ;;  %929 = vrot.lane.b32.xlu1 %v3728_v37, %s3498_s12 }
  0x69   : > { %1311 = vrot.lane.b32.xlu0 %v3738_v39, %s3501_s25  ;;  %1437 = vrot.lane.b32.xlu1 %v571_v40, %s3502_s8 }
  0x6d   : > { %931 = vrot.lane.b32.xlu0 %v3738_v39, %s3498_s12  ;;  %1057 = vrot.lane.b32.xlu1 %v571_v40, %s3499_s13 }
  0x71   : > { %1439 = vrot.lane.b32.xlu0 %v572_v41, %s3502_s8  ;;  %1565 = vrot.lane.b32.xlu1 %v603_v42, %s3503_s17 }
  0x75   : > { %677 = vrot.lane.b32.xlu0 %v571_v40, %s3497_s11  ;;  %1059 = vrot.lane.b32.xlu1 %v572_v41, %s3499_s13  ;;  %v577_v40 = vld [vmem:[#allocation2 + $0x91] sm:$0xff] }
  0x79   : > { %1185 = vrot.lane.b32.xlu0 %v603_v42, %s3500_s14  ;;  %1567 = vrot.lane.b32.xlu1 %v604_v43, %s3503_s17 }
  0x7d   : > { %679 = vrot.lane.b32.xlu0 %v572_v41, %s3497_s11  ;;  %805 = vrot.lane.b32.xlu1 %v603_v42, %s3496_s10 }
  0x81   : > { %1187 = vrot.lane.b32.xlu0 %v604_v43, %s3500_s14  ;;  %1313 = vrot.lane.b32.xlu1 %v3756_v45, %s3501_s25 }
  0x85   : > { %807 = vrot.lane.b32.xlu0 %v604_v43, %s3496_s10  ;;  %933 = vrot.lane.b32.xlu1 %v3756_v45, %s3498_s12 }
  0x88   : > { %v794_v53 = vpop.permute.xlu1 %793 }
  0x89   : > { %1315 = vrot.lane.b32.xlu0 %v3766_v47, %s3501_s25  ;;  %1441 = vrot.lane.b32.xlu1 %v573_v48, %s3502_s8  ;;  %v666_v54 = vpop.permute.xlu0 %665 }
  0x8a   : > { %v1657_v14 = vsel %vm223_vm0, %v344_v12, %v666_v54  ;;  %v609_v54 = vld [vmem:[#allocation2 + $0x92] sm:$0xff] }
  0x8b   : > { %v1690_v19 = vsel %vm1689_vm3, %v1657_v14, %v794_v53  ;;  %v578_v53 = vld [vmem:[#allocation2 + $0x99] sm:$0xff] }
  0x8d   : > { %935 = vrot.lane.b32.xlu0 %v3766_v47, %s3498_s12  ;;  %1061 = vrot.lane.b32.xlu1 %v573_v48, %s3499_s13 }
  0x91   : > { %1443 = vrot.lane.b32.xlu0 %v574_v49, %s3502_s8  ;;  %1569 = vrot.lane.b32.xlu1 %v605_v50, %s3503_s17 }
  0x95   : > { %681 = vrot.lane.b32.xlu0 %v573_v48, %s3497_s11  ;;  %1063 = vrot.lane.b32.xlu1 %v574_v49, %s3499_s13 }
  0x99   : > { %1189 = vrot.lane.b32.xlu0 %v605_v50, %s3500_s14  ;;  %1571 = vrot.lane.b32.xlu1 %v606_v51, %s3503_s17 }
  0x9a   : > { %v3786_v56 = vpop.permute.xlu1 %795 }
  0x9b   : > { %v3788_v57 = vpop.permute.xlu0 %667 }
  0x9c   : > { %v1658_v31 = vsel %vm223_vm0, %v345_v25, %v3788_v57  ;;  %v3925_v25 = vld [vmem:[#allocation2 + $0xb0] sm:$0xff] }
  0x9d   : > { %683 = vrot.lane.b32.xlu0 %v574_v49, %s3497_s11  ;;  %809 = vrot.lane.b32.xlu1 %v605_v50, %s3496_s10  ;;  %v1691_v36 = vsel %vm1689_vm3, %v1658_v31, %v3786_v56 }
  0xa1   : > { %1191 = vrot.lane.b32.xlu0 %v606_v51, %s3500_s14  ;;  %1317 = vrot.lane.b32.xlu1 %v3784_v55, %s3501_s25 }
  0xa3   : > { %v3795_v59 = vpop.permute.xlu1 %923  ;;  %v922_v60 = vpop.permute.xlu0 %921 }
  0xa4   : > { %v1723_v21 = vsel %vm1722_vm4, %v1690_v19, %v922_v60  ;;  %v1724_v41 = vsel %vm1722_vm4, %v1691_v36, %v3795_v59  ;;  %v610_v60 = vld [vmem:[#allocation2 + $0x9a] sm:$0xff] }
  0xa5   : > { %811 = vrot.lane.b32.xlu0 %v606_v51, %s3496_s10  ;;  %937 = vrot.lane.b32.xlu1 %v3784_v55, %s3498_s12 }
  0xa7   : > { %v1050_v63 = vpop.permute.xlu0 %1049  ;;  %v3802_v0 = vpop.permute.xlu1 %669 }
  0xa8   : > { %v1756_v26 = vsel %vm1755_vm5, %v1723_v21, %v1050_v63 }
  0xa9   : > { %1319 = vrot.lane.b32.xlu0 %v3800_v61, %s3501_s25  ;;  %1445 = vrot.lane.b32.xlu1 %v575_v62, %s3502_s8 }
  0xab   : > { %v3807_v1 = vpop.permute.xlu0 %1051  ;;  %v1178_v2 = vpop.permute.xlu1 %1177 }
  0xac   : > { %v1789_v27 = vsel %vm1788_vm6, %v1756_v26, %v1178_v2  ;;  %v1757_v44 = vsel %vm1755_vm5, %v1724_v41, %v3807_v1  ;;  %v299_v1 = vld [vmem:[%s3643_s9 + $0xa0] sm:$0xff]  ;;  %v579_v26 = vld [vmem:[#allocation2 + $0xa9] sm:$0xff] }
  0xad   : > { %939 = vrot.lane.b32.xlu0 %v3800_v61, %s3498_s12  ;;  %1065 = vrot.lane.b32.xlu1 %v575_v62, %s3499_s13  ;;  %332 = vst.msk [vmem:[#allocation2 + $0x109] sm:$0xff] %vm223_vm0, %v299_v1 }
  0xaf   : > { %v3812_v5 = vpop.permute.xlu0 %671  ;;  %v3814_v6 = vpop.permute.xlu1 %797 }
  0xb0   : > { %v1660_v21 = vsel %vm223_vm0, %v3669_v15, %v3812_v5 }
  0xb1   : > { %1447 = vrot.lane.b32.xlu0 %v576_v3, %s3502_s8  ;;  %1573 = vrot.lane.b32.xlu1 %v607_v4, %s3503_s17 }
  0xb3   : > { %v1180_v7 = vpop.permute.xlu0 %1179  ;;  %v1306_v8 = vpop.permute.xlu1 %1305 }
  0xb4   : > { %v1822_v30 = vsel %vm1821_vm7, %v1789_v27, %v1306_v8  ;;  %v1790_v46 = vsel %vm1788_vm6, %v1757_v44, %v1180_v7  ;;  %v3899_v8 = vld [vmem:[#allocation2 + $0xa8] sm:$0xff]  ;;  %v612_v44 = vld [vmem:[#allocation2 + $0xb2] sm:$0xff] }
  0xb5   : > { %685 = vrot.lane.b32.xlu0 %v575_v62, %s3497_s11  ;;  %1067 = vrot.lane.b32.xlu1 %v576_v3, %s3499_s13 }
  0xb7   : > { %v3820_v10 = vpop.permute.xlu0 %799  ;;  %v3822_v11 = vpop.permute.xlu1 %925 }
  0xb9   : > { %1193 = vrot.lane.b32.xlu0 %v607_v4, %s3500_s14  ;;  %1575 = vrot.lane.b32.xlu1 %v608_v9, %s3503_s17 }
  0xbb   : > { %v1308_v17 = vpop.permute.xlu0 %1307  ;;  %v1434_v18 = vpop.permute.xlu1 %1433 }
  0xbc   : > { %v1855_v32 = vsel %vm1854_vm8, %v1822_v30, %v1434_v18  ;;  %v1823_v48 = vsel %vm1821_vm7, %v1790_v46, %v1308_v17 }
  0xbd   : > { %687 = vrot.lane.b32.xlu0 %v576_v3, %s3497_s11  ;;  %813 = vrot.lane.b32.xlu1 %v607_v4, %s3496_s10  ;;  %v1659_v4 = vsel %vm223_vm0, %v3671_v16, %v3802_v0  ;;  %v300_v0 = vld [vmem:[%s3643_s9 + $0xa8] sm:$0xff] }
  0xbe   : > { %v1692_v7 = vsel %vm1689_vm3, %v1659_v4, %v3814_v6  ;;  %333 = vst.msk [vmem:[#allocation2 + $0x111] sm:$0xff] %vm223_vm0, %v300_v0 }
  0xbf   : > { %v3835_v23 = vpop.permute.xlu0 %927  ;;  %v3837_v24 = vpop.permute.xlu1 %1053 }
  0xc1   : > { %1195 = vrot.lane.b32.xlu0 %v608_v9, %s3500_s14  ;;  %1321 = vrot.lane.b32.xlu1 %v3832_v20, %s3501_s25 }
  0xc3   : > { %v1436_v33 = vpop.permute.xlu0 %1435  ;;  %v1562_v34 = vpop.permute.xlu1 %1561 }
  0xc4   : > { %v1888_v35 = vsel %vm1887_vm9, %v1855_v32, %v1562_v34  ;;  %v1856_v49 = vsel %vm1854_vm8, %v1823_v48, %v1436_v33  ;;  %v580_v34 = vld [vmem:[#allocation2 + $0xb1] sm:$0xff] }
  0xc5   : > { %815 = vrot.lane.b32.xlu0 %v608_v9, %s3496_s10  ;;  %941 = vrot.lane.b32.xlu1 %v3832_v20, %s3498_s12  ;;  %v1725_v9 = vsel %vm1722_vm4, %v1692_v7, %v3822_v11 }
  0xc6   : > { %3147 = vmatprep.mubr.msk.f32.mxu0 %vm1932_vm10, %v1888_v35  ;;  %v1758_v14 = vsel %vm1755_vm5, %v1725_v9, %v3837_v24  ;;  %v1693_v24 = vsel %vm1689_vm3, %v1660_v21, %v3820_v10  ;;  %v611_v35 = vld [vmem:[#allocation2 + $0xaa] sm:$0xff]  ;;  %v613_v21 = vld [vmem:[#allocation2 + $0xc2] sm:$0xff] }
  0xc7   : > { %v3861_v42 = vpop.permute.xlu0 %673  ;;  %v1056_v43 = vpop.permute.xlu1 %1055  ;;  %v1726_v27 = vsel %vm1722_vm4, %v1693_v24, %v3835_v23 }
  0xc8   : > { %v1759_v15 = vsel %vm1755_vm5, %v1726_v27, %v1056_v43 }
  0xc9   : > { %1323 = vrot.lane.b32.xlu0 %v3857_v38, %s3501_s25  ;;  %1449 = vrot.lane.b32.xlu1 %v577_v40, %s3502_s8 }
  0xcb   : > { %v1182_v50 = vpop.permute.xlu0 %1181  ;;  %v1564_v51 = vpop.permute.xlu1 %1563 }
  0xcc   : > { %v1889_v52 = vsel %vm1887_vm9, %v1856_v49, %v1564_v51  ;;  %v1791_v16 = vsel %vm1788_vm6, %v1758_v14, %v1182_v50  ;;  %v301_v49 = vld [vmem:[%s3643_s9 + $0xb0] sm:$0xff]  ;;  %v581_v14 = vld [vmem:[#allocation2 + $0xc1] sm:$0xff] }
  0xcd   : > { %943 = vrot.lane.b32.xlu0 %v3857_v38, %s3498_s12  ;;  %1069 = vrot.lane.b32.xlu1 %v577_v40, %s3499_s13  ;;  %334 = vst.msk [vmem:[#allocation2 + $0x121] sm:$0xff] %vm223_vm0, %v301_v49 }
  0xce   : > { %3148 = vmatmul.mubr.msk.f32.vlgmr.msra.gmra.mrb[0].mxu0 %vm1932_vm10, %v1889_v52  ;;  %v1661_v52 = vsel %vm223_vm0, %v3685_v22, %v3861_v42  ;;  %v302_v22 = vld [vmem:[%s3643_s9 + $0xb8] sm:$0xff] }
  0xcf   : > { %v3876_v56 = vpop.permute.xlu0 %675  ;;  %v3878_v57 = vpop.permute.xlu1 %801  ;;  %335 = vst.msk [vmem:[#allocation2 + $0x129] sm:$0xff] %vm223_vm0, %v302_v22 }
  0xd0   : > { %v1662_v7 = vsel %vm223_vm0, %v3707_v29, %v3876_v56 }
  0xd1   : > { %1451 = vrot.lane.b32.xlu0 %v578_v53, %s3502_s8  ;;  %1577 = vrot.lane.b32.xlu1 %v609_v54, %s3503_s17 }
  0xd3   : > { %v1184_v58 = vpop.permute.xlu0 %1183  ;;  %v1310_v59 = vpop.permute.xlu1 %1309 }
  0xd4   : > { %v1824_v6 = vsel %vm1821_vm7, %v1791_v16, %v1310_v59  ;;  %v1792_v5 = vsel %vm1788_vm6, %v1759_v15, %v1184_v58  ;;  %v614_v15 = vld [vmem:[#allocation2 + $0xca] sm:$0xff] }
  0xd5   : > { %689 = vrot.lane.b32.xlu0 %v577_v40, %s3497_s11  ;;  %1071 = vrot.lane.b32.xlu1 %v578_v53, %s3499_s13 }
  0xd7   : > { %v3884_v62 = vpop.permute.xlu0 %803  ;;  %v3886_v63 = vpop.permute.xlu1 %929 }
  0xd8   : > { %v1695_v9 = vsel %vm1689_vm3, %v1662_v7, %v3884_v62  ;;  %v584_v7 = vld [vmem:[#allocation2 + $0xe1] sm:$0xff] }
  0xd9   : > { %1197 = vrot.lane.b32.xlu0 %v609_v54, %s3500_s14  ;;  %1579 = vrot.lane.b32.xlu1 %v610_v60, %s3503_s17 }
  0xdb   : > { %v1312_v2 = vpop.permute.xlu0 %1311  ;;  %v1438_v3 = vpop.permute.xlu1 %1437 }
  0xdc   : > { %v1857_v11 = vsel %vm1854_vm8, %v1824_v6, %v1438_v3  ;;  %v1825_v10 = vsel %vm1821_vm7, %v1792_v5, %v1312_v2 }
  0xdd   : > { %691 = vrot.lane.b32.xlu0 %v578_v53, %s3497_s11  ;;  %817 = vrot.lane.b32.xlu1 %v609_v54, %s3496_s10  ;;  %v1694_v53 = vsel %vm1689_vm3, %v1661_v52, %v3878_v57  ;;  %v3966_v54 = vld [vmem:[#allocation2 + $0xc0] sm:$0xff] }
  0xde   : > { %v1727_v58 = vsel %vm1722_vm4, %v1694_v53, %v3886_v63 }
  0xdf   : > { %v3903_v12 = vpop.permute.xlu0 %931  ;;  %v1058_v13 = vpop.permute.xlu1 %1057 }
  0xe0   : > { %v1760_v1 = vsel %vm1755_vm5, %v1727_v58, %v1058_v13  ;;  %v3991_v13 = vld [vmem:[#allocation2 + $0xc8] sm:$0xff]  ;;  %v1728_v16 = vsel %vm1722_vm4, %v1695_v9, %v3903_v12  ;;  %v2290_v58 = vld [vmem:[%s4989_s3] sm:$0xff] }
  0xe1   : > { %1199 = vrot.lane.b32.xlu0 %v610_v60, %s3500_s14  ;;  %1325 = vrot.lane.b32.xlu1 %v3899_v8, %s3501_s25  ;;  %v615_v9 = vld [vmem:[#allocation2 + $0xda] sm:$0xff] }
  0xe2   : > { %3195 = vmatprep.subr.mxu1 %v2290_v58 }
  0xe3   : > { %v1440_v17 = vpop.permute.xlu0 %1439  ;;  %v1566_v18 = vpop.permute.xlu1 %1565  ;;  %3196 = vmatpush3.msra.mxu1 %v2290_v58  ;;  %v617_v58 = vld [vmem:[#allocation2 + $0xf2] sm:$0xff] }
  0xe4   : > { %v1890_v19 = vsel %vm1887_vm9, %v1857_v11, %v1566_v18  ;;  %v1858_v31 = vsel %vm1854_vm8, %v1825_v10, %v1440_v17 }
  0xe5   : > { %819 = vrot.lane.b32.xlu0 %v610_v60, %s3496_s10  ;;  %945 = vrot.lane.b32.xlu1 %v3899_v8, %s3498_s12 }
  0xe6   : > { %3150 = vmatprep.mubr.msk.f32.mxu0 %vm1932_vm10, %v1890_v19  ;;  %v582_v19 = vld [vmem:[#allocation2 + $0xc9] sm:$0xff] }
  0xe7   : > { %v3929_v28 = vpop.permute.xlu0 %677  ;;  %v1060_v30 = vpop.permute.xlu1 %1059 }
  0xe8   : > { %v1761_v29 = vsel %vm1755_vm5, %v1728_v16, %v1060_v30 }
  0xe9   : > { %1327 = vrot.lane.b32.xlu0 %v3925_v25, %s3501_s25  ;;  %1453 = vrot.lane.b32.xlu1 %v579_v26, %s3502_s8 }
  0xeb   : > { %v1186_v32 = vpop.permute.xlu0 %1185  ;;  %v1568_v33 = vpop.permute.xlu1 %1567 }
  0xec   : > { %v1891_v23 = vsel %vm1887_vm9, %v1858_v31, %v1568_v33  ;;  %v1793_v2 = vsel %vm1788_vm6, %v1760_v1, %v1186_v32  ;;  %v303_v31 = vld [vmem:[%s3643_s9 + $0xc0] sm:$0xff] }
  0xed   : > { %947 = vrot.lane.b32.xlu0 %v3925_v25, %s3498_s12  ;;  %1073 = vrot.lane.b32.xlu1 %v579_v26, %s3499_s13  ;;  %336 = vst.msk [vmem:[#allocation2 + $0x139] sm:$0xff] %vm223_vm0, %v303_v31  ;;  %v4064_v1 = vld [vmem:[#allocation2 + $0xe0] sm:$0xff] }
  0xee   : > { %3151 = vmatmul.mubr.msk.f32.gmra.mrb[2].mxu0 %vm1932_vm10, %v1891_v23  ;;  %v1663_v23 = vsel %vm223_vm0, %v3728_v37, %v3929_v28  ;;  %v304_v28 = vld [vmem:[%s3643_s9 + $0xc8] sm:$0xff] }
  0xef   : > { %v3943_v36 = vpop.permute.xlu0 %679  ;;  %v3945_v40 = vpop.permute.xlu1 %805  ;;  %337 = vst.msk [vmem:[#allocation2 + $0x141] sm:$0xff] %vm223_vm0, %v304_v28 }
  0xf0   : > { %v1664_v53 = vsel %vm223_vm0, %v3738_v39, %v3943_v36 }
  0xf1   : > { %1455 = vrot.lane.b32.xlu0 %v580_v34, %s3502_s8  ;;  %1581 = vrot.lane.b32.xlu1 %v611_v35, %s3503_s17 }
  0xf3   : > { %v1188_v41 = vpop.permute.xlu0 %1187  ;;  %v1314_v43 = vpop.permute.xlu1 %1313 }
  0xf4   : > { %v1826_v42 = vsel %vm1821_vm7, %v1793_v2, %v1314_v43  ;;  %v1794_v56 = vsel %vm1788_vm6, %v1761_v29, %v1188_v41  ;;  %v583_v2 = vld [vmem:[#allocation2 + $0xd9] sm:$0xff] }
  0xf5   : > { %693 = vrot.lane.b32.xlu0 %v579_v26, %s3497_s11  ;;  %1075 = vrot.lane.b32.xlu1 %v580_v34, %s3499_s13 }
  0xf7   : > { %v3951_v46 = vpop.permute.xlu0 %807  ;;  %v3953_v48 = vpop.permute.xlu1 %933 }
  0xf9   : > { %1201 = vrot.lane.b32.xlu0 %v611_v35, %s3500_s14  ;;  %1583 = vrot.lane.b32.xlu1 %v612_v44, %s3503_s17 }
  0xfb   : > { %v1316_v50 = vpop.permute.xlu0 %1315  ;;  %v1442_v51 = vpop.permute.xlu1 %1441 }
  0xfc   : > { %v1859_v57 = vsel %vm1854_vm8, %v1826_v42, %v1442_v51  ;;  %v1827_v62 = vsel %vm1821_vm7, %v1794_v56, %v1316_v50  ;;  %v616_v56 = vld [vmem:[#allocation2 + $0xe2] sm:$0xff] }
  0xfd   : > { %695 = vrot.lane.b32.xlu0 %v580_v34, %s3497_s11  ;;  %821 = vrot.lane.b32.xlu1 %v611_v35, %s3496_s10  ;;  %v1696_v34 = vsel %vm1689_vm3, %v1663_v23, %v3945_v40  ;;  %v4034_v35 = vld [vmem:[#allocation2 + $0xd8] sm:$0xff] }
  0xfe   : > { %v1729_v41 = vsel %vm1722_vm4, %v1696_v34, %v3953_v48 }
  0xff   : > { %v3970_v59 = vpop.permute.xlu0 %935  ;;  %v1062_v60 = vpop.permute.xlu1 %1061 }
 0x100   : > { %v1762_v49 = vsel %vm1755_vm5, %v1729_v41, %v1062_v60  ;;  %v1697_v60 = vsel %vm1689_vm3, %v1664_v53, %v3951_v46  ;;  %v586_v53 = vld [vmem:[#allocation2 + $0xf9] sm:$0xff] }
 0x101   : > { %1203 = vrot.lane.b32.xlu0 %v612_v44, %s3500_s14  ;;  %1329 = vrot.lane.b32.xlu1 %v3966_v54, %s3501_s25  ;;  %v1730_v39 = vsel %vm1722_vm4, %v1697_v60, %v3970_v59 }
 0x103   : > { %v1444_v63 = vpop.permute.xlu0 %1443  ;;  %v1570_v3 = vpop.permute.xlu1 %1569 }
 0x104   : > { %v1892_v4 = vsel %vm1887_vm9, %v1859_v57, %v1570_v3  ;;  %v1860_v11 = vsel %vm1854_vm8, %v1827_v62, %v1444_v63 }
 0x105   : > { %823 = vrot.lane.b32.xlu0 %v612_v44, %s3496_s10  ;;  %949 = vrot.lane.b32.xlu1 %v3966_v54, %s3498_s12 }
 0x106   : > { %3153 = vmatprep.mubr.msk.f32.mxu0 %vm1932_vm10, %v1892_v4 }
 0x107   : > { %v3995_v0 = vpop.permute.xlu0 %681  ;;  %v3997_v6 = vpop.permute.xlu1 %1063 }
 0x108   : > { %v1763_v42 = vsel %vm1755_vm5, %v1730_v39, %v3997_v6 }
 0x109   : > { %1331 = vrot.lane.b32.xlu0 %v3991_v13, %s3501_s25  ;;  %1457 = vrot.lane.b32.xlu1 %v581_v14, %s3502_s8 }
 0x10b   : > { %v1190_v17 = vpop.permute.xlu0 %1189  ;;  %v1572_v18 = vpop.permute.xlu1 %1571 }
 0x10c   : > { %v1893_v12 = vsel %vm1887_vm9, %v1860_v11, %v1572_v18  ;;  %v1795_v37 = vsel %vm1788_vm6, %v1762_v49, %v1190_v17  ;;  %v305_v17 = vld [vmem:[%s3643_s9 + $0xd0] sm:$0xff]  ;;  %v4134_v49 = vld [vmem:[#allocation2 + $0xf8] sm:$0xff] }
 0x10d   : > { %951 = vrot.lane.b32.xlu0 %v3991_v13, %s3498_s12  ;;  %1077 = vrot.lane.b32.xlu1 %v581_v14, %s3499_s13  ;;  %338 = vst.msk [vmem:[#allocation2 + $0x151] sm:$0xff] %vm223_vm0, %v305_v17 }
 0x10e   : > { %3154 = vmatmul.mubr.msk.f32.gmra.mrb[4].mxu0 %vm1932_vm10, %v1893_v12 }
 0x10f   : > { %v4011_v24 = vpop.permute.xlu0 %683  ;;  %v4013_v26 = vpop.permute.xlu1 %809 }
 0x110   : > { %v1666_v41 = vsel %vm223_vm0, %v3766_v47, %v4011_v24 }
 0x111   : > { %1459 = vrot.lane.b32.xlu0 %v582_v19, %s3502_s8  ;;  %1585 = vrot.lane.b32.xlu1 %v613_v21, %s3503_s17 }
 0x113   : > { %v1192_v27 = vpop.permute.xlu0 %1191  ;;  %v1318_v30 = vpop.permute.xlu1 %1317 }
 0x114   : > { %v1828_v40 = vsel %vm1821_vm7, %v1795_v37, %v1318_v30  ;;  %v1796_v57 = vsel %vm1788_vm6, %v1763_v42, %v1192_v27  ;;  %v4108_v27 = vld [vmem:[#allocation2 + $0xf0] sm:$0xff]  ;;  %v618_v42 = vld [vmem:[#allocation2 + $0xfa] sm:$0xff] }
 0x115   : > { %697 = vrot.lane.b32.xlu0 %v581_v14, %s3497_s11  ;;  %1079 = vrot.lane.b32.xlu1 %v582_v19, %s3499_s13  ;;  %v585_v37 = vld [vmem:[#allocation2 + $0xf1] sm:$0xff] }
 0x117   : > { %v4019_v5 = vpop.permute.xlu0 %811  ;;  %v4021_v10 = vpop.permute.xlu1 %937 }
 0x119   : > { %1205 = vrot.lane.b32.xlu0 %v613_v21, %s3500_s14  ;;  %1587 = vrot.lane.b32.xlu1 %v614_v15, %s3503_s17 }
 0x11b   : > { %v1320_v32 = vpop.permute.xlu0 %1319  ;;  %v1446_v33 = vpop.permute.xlu1 %1445 }
 0x11c   : > { %v1861_v48 = vsel %vm1854_vm8, %v1828_v40, %v1446_v33  ;;  %v1829_v46 = vsel %vm1821_vm7, %v1796_v57, %v1320_v32 }
 0x11d   : > { %699 = vrot.lane.b32.xlu0 %v582_v19, %s3497_s11  ;;  %825 = vrot.lane.b32.xlu1 %v613_v21, %s3496_s10  ;;  %v1665_v19 = vsel %vm223_vm0, %v3756_v45, %v3995_v0  ;;  %v306_v0 = vld [vmem:[%s3643_s9 + $0xd8] sm:$0xff] }
 0x11e   : > { %v1698_v21 = vsel %vm1689_vm3, %v1665_v19, %v4013_v26  ;;  %339 = vst.msk [vmem:[#allocation2 + $0x159] sm:$0xff] %vm223_vm0, %v306_v0 }
 0x11f   : > { %v4038_v43 = vpop.permute.xlu0 %939  ;;  %v4040_v44 = vpop.permute.xlu1 %1065  ;;  %v1731_v30 = vsel %vm1722_vm4, %v1698_v21, %v4021_v10 }
 0x120   : > { %v1764_v32 = vsel %vm1755_vm5, %v1731_v30, %v4040_v44  ;;  %v1699_v44 = vsel %vm1689_vm3, %v1666_v41, %v4019_v5  ;;  %v619_v41 = vld [vmem:[#allocation2 + $0x10a] sm:$0xff] }
 0x121   : > { %1207 = vrot.lane.b32.xlu0 %v614_v15, %s3500_s14  ;;  %1333 = vrot.lane.b32.xlu1 %v4034_v35, %s3501_s25  ;;  %v1732_v28 = vsel %vm1722_vm4, %v1699_v44, %v4038_v43 }
 0x123   : > { %v1448_v50 = vpop.permute.xlu0 %1447  ;;  %v1574_v51 = vpop.permute.xlu1 %1573 }
 0x124   : > { %v1894_v52 = vsel %vm1887_vm9, %v1861_v48, %v1574_v51  ;;  %v1862_v63 = vsel %vm1854_vm8, %v1829_v46, %v1448_v50 }
 0x125   : > { %827 = vrot.lane.b32.xlu0 %v614_v15, %s3496_s10  ;;  %953 = vrot.lane.b32.xlu1 %v4034_v35, %s3498_s12 }
 0x126   : > { %3156 = vmatprep.mubr.msk.f32.mxu0 %vm1932_vm10, %v1894_v52 }
 0x127   : > { %v4068_v36 = vpop.permute.xlu0 %685  ;;  %v4070_v22 = vpop.permute.xlu1 %1067 }
 0x128   : > { %v1765_v47 = vsel %vm1755_vm5, %v1732_v28, %v4070_v22 }
 0x129   : > { %1335 = vrot.lane.b32.xlu0 %v4064_v1, %s3501_s25  ;;  %1461 = vrot.lane.b32.xlu1 %v583_v2, %s3502_s8 }
 0x12b   : > { %v1194_v59 = vpop.permute.xlu0 %1193  ;;  %v1576_v3 = vpop.permute.xlu1 %1575 }
 0x12c   : > { %v1895_v4 = vsel %vm1887_vm9, %v1862_v63, %v1576_v3  ;;  %v1797_v45 = vsel %vm1788_vm6, %v1764_v32, %v1194_v59  ;;  %v307_v63 = vld [vmem:[%s3643_s9 + $0xe0] sm:$0xff]  ;;  %v587_v32 = vld [vmem:[#allocation2 + $0x109] sm:$0xff] }
 0x12d   : > { %955 = vrot.lane.b32.xlu0 %v4064_v1, %s3498_s12  ;;  %1081 = vrot.lane.b32.xlu1 %v583_v2, %s3499_s13  ;;  %340 = vst.msk [vmem:[#allocation2 + $0x169] sm:$0xff] %vm223_vm0, %v307_v63 }
 0x12e   : > { %3157 = vmatmul.mubr.msk.f32.gmra.mrb[6].mxu0 %vm1932_vm10, %v1895_v4  ;;  %v1667_v4 = vsel %vm223_vm0, %v3784_v55, %v4068_v36  ;;  %v308_v55 = vld [vmem:[%s3643_s9 + $0xe8] sm:$0xff] }
 0x12f   : > { %v4085_v14 = vpop.permute.xlu0 %687  ;;  %v4087_v16 = vpop.permute.xlu1 %813  ;;  %341 = vst.msk [vmem:[#allocation2 + $0x171] sm:$0xff] %vm223_vm0, %v308_v55 }
 0x130   : > { %v1668_v21 = vsel %vm223_vm0, %v3800_v61, %v4085_v14 }
 0x131   : > { %1463 = vrot.lane.b32.xlu0 %v584_v7, %s3502_s8  ;;  %1589 = vrot.lane.b32.xlu1 %v615_v9, %s3503_s17 }
 0x133   : > { %v1196_v6 = vpop.permute.xlu0 %1195  ;;  %v1322_v29 = vpop.permute.xlu1 %1321 }
 0x134   : > { %v1830_v26 = vsel %vm1821_vm7, %v1797_v45, %v1322_v29  ;;  %v1798_v24 = vsel %vm1788_vm6, %v1765_v47, %v1196_v6  ;;  %v620_v47 = vld [vmem:[#allocation2 + $0x112] sm:$0xff] }
 0x135   : > { %701 = vrot.lane.b32.xlu0 %v583_v2, %s3497_s11  ;;  %1083 = vrot.lane.b32.xlu1 %v584_v7, %s3499_s13 }
 0x137   : > { %v4093_v62 = vpop.permute.xlu0 %815  ;;  %v4095_v11 = vpop.permute.xlu1 %941 }
 0x138   : > { %v1701_v30 = vsel %vm1689_vm3, %v1668_v21, %v4093_v62  ;;  %v621_v21 = vld [vmem:[#allocation2 + $0x122] sm:$0xff] }
 0x139   : > { %1209 = vrot.lane.b32.xlu0 %v615_v9, %s3500_s14  ;;  %1591 = vrot.lane.b32.xlu1 %v616_v56, %s3503_s17 }
 0x13b   : > { %v1324_v18 = vpop.permute.xlu0 %1323  ;;  %v1450_v12 = vpop.permute.xlu1 %1449 }
 0x13c   : > { %v1863_v10 = vsel %vm1854_vm8, %v1830_v26, %v1450_v12  ;;  %v1831_v5 = vsel %vm1821_vm7, %v1798_v24, %v1324_v18 }
 0x13d   : > { %703 = vrot.lane.b32.xlu0 %v584_v7, %s3497_s11  ;;  %829 = vrot.lane.b32.xlu1 %v615_v9, %s3496_s10  ;;  %v1700_v7 = vsel %vm1689_vm3, %v1667_v4, %v4087_v16  ;;  %v4176_v9 = vld [vmem:[#allocation2 + $0x108] sm:$0xff] }
 0x13e   : > { %v1733_v6 = vsel %vm1722_vm4, %v1700_v7, %v4095_v11 }
 0x13f   : > { %v4112_v15 = vpop.permute.xlu0 %943  ;;  %v1070_v31 = vpop.permute.xlu1 %1069 }
 0x140   : > { %v1766_v17 = vsel %vm1755_vm5, %v1733_v6, %v1070_v31  ;;  %v4201_v31 = vld [vmem:[#allocation2 + $0x110] sm:$0xff]  ;;  %v1734_v45 = vsel %vm1722_vm4, %v1701_v30, %v4112_v15 }
 0x141   : > { %1211 = vrot.lane.b32.xlu0 %v616_v56, %s3500_s14  ;;  %1337 = vrot.lane.b32.xlu1 %v4108_v27, %s3501_s25 }
 0x143   : > { %v1452_v33 = vpop.permute.xlu0 %1451  ;;  %v1578_v23 = vpop.permute.xlu1 %1577 }
 0x144   : > { %v1896_v34 = vsel %vm1887_vm9, %v1863_v10, %v1578_v23  ;;  %v1864_v50 = vsel %vm1854_vm8, %v1831_v5, %v1452_v33 }
 0x145   : > { %831 = vrot.lane.b32.xlu0 %v616_v56, %s3496_s10  ;;  %957 = vrot.lane.b32.xlu1 %v4108_v27, %s3498_s12 }
 0x146   : > { %3159 = vmatprep.mubr.msk.f32.mxu0 %vm1932_vm10, %v1896_v34  ;;  %v588_v34 = vld [vmem:[#allocation2 + $0x111] sm:$0xff] }
 0x147   : > { %v4138_v40 = vpop.permute.xlu0 %689  ;;  %v1072_v48 = vpop.permute.xlu1 %1071 }
 0x148   : > { %v1767_v61 = vsel %vm1755_vm5, %v1734_v45, %v1072_v48 }
 0x149   : > { %1339 = vrot.lane.b32.xlu0 %v4134_v49, %s3501_s25  ;;  %1465 = vrot.lane.b32.xlu1 %v585_v37, %s3502_s8 }
 0x14b   : > { %v1198_v51 = vpop.permute.xlu0 %1197  ;;  %v1580_v52 = vpop.permute.xlu1 %1579 }
 0x14c   : > { %v1897_v43 = vsel %vm1887_vm9, %v1864_v50, %v1580_v52  ;;  %v1799_v18 = vsel %vm1788_vm6, %v1766_v17, %v1198_v51  ;;  %v309_v50 = vld [vmem:[%s3643_s9 + $0xf0] sm:$0xff]  ;;  %v589_v17 = vld [vmem:[#allocation2 + $0x121] sm:$0xff] }
 0x14d   : > { %959 = vrot.lane.b32.xlu0 %v4134_v49, %s3498_s12  ;;  %1085 = vrot.lane.b32.xlu1 %v585_v37, %s3499_s13  ;;  %342 = vst.msk [vmem:[#allocation2 + $0x181] sm:$0xff] %vm223_vm0, %v309_v50 }
 0x14e   : > { %3160 = vmatmul.mubr.msk.f32.gmra.mrb[8].mxu0 %vm1932_vm10, %v1897_v43  ;;  %v1669_v43 = vsel %vm223_vm0, %v3832_v20, %v4138_v40  ;;  %v310_v20 = vld [vmem:[%s3643_s9 + $0xf8] sm:$0xff]  ;;  %s3504_s9 = smov [#allocation3]  }
 0x14f   : > { %v4153_v60 = vpop.permute.xlu0 %691  ;;  %v4155_v2 = vpop.permute.xlu1 %817  ;;  %343 = vst.msk [vmem:[#allocation2 + $0x189] sm:$0xff] %vm223_vm0, %v310_v20  ;;  %s3435_s30 = sshll.u32 %s3504_s9, 4  ;;  %s3436_s30 = int_to_ptr.vmem [resolvable:$false] %s3435_s30 }
 0x150   : > { %v1670_v7 = vsel %vm223_vm0, %v3857_v38, %v4153_v60 }
 0x151   : > { %1467 = vrot.lane.b32.xlu0 %v586_v53, %s3502_s8  ;;  %1593 = vrot.lane.b32.xlu1 %v617_v58, %s3503_s17 }
 0x153   : > { %v1200_v39 = vpop.permute.xlu0 %1199  ;;  %v1326_v22 = vpop.permute.xlu1 %1325 }
 0x154   : > { %v1832_v36 = vsel %vm1821_vm7, %v1799_v18, %v1326_v22  ;;  %v1800_v14 = vsel %vm1788_vm6, %v1767_v61, %v1200_v39  ;;  %v622_v61 = vld [vmem:[#allocation2 + $0x12a] sm:$0xff] }
 0x155   : > { %705 = vrot.lane.b32.xlu0 %v585_v37, %s3497_s11  ;;  %1087 = vrot.lane.b32.xlu1 %v586_v53, %s3499_s13 }
 0x157   : > { %v4161_v57 = vpop.permute.xlu0 %819  ;;  %v4163_v46 = vpop.permute.xlu1 %945 }
 0x158   : > { %v1703_v6 = vsel %vm1689_vm3, %v1670_v7, %v4161_v57 }
 0x159   : > { %1213 = vrot.lane.b32.xlu0 %v617_v58, %s3500_s14  ;;  %1595 = vrot.lane.b32.xlu1 %v618_v42, %s3503_s17 }
 0x15b   : > { %v1328_v59 = vpop.permute.xlu0 %1327  ;;  %v1454_v3 = vpop.permute.xlu1 %1453 }
 0x15c   : > { %v1865_v16 = vsel %vm1854_vm8, %v1832_v36, %v1454_v3  ;;  %v1833_v62 = vsel %vm1821_vm7, %v1800_v14, %v1328_v59 }
 0x15d   : > { %707 = vrot.lane.b32.xlu0 %v586_v53, %s3497_s11  ;;  %833 = vrot.lane.b32.xlu1 %v617_v58, %s3496_s10  ;;  %v1702_v53 = vsel %vm1689_vm3, %v1669_v43, %v4155_v2  ;;  %v4242_v58 = vld [vmem:[#allocation2 + $0x120] sm:$0xff] }
 0x15e   : > { %v1735_v39 = vsel %vm1722_vm4, %v1702_v53, %v4163_v46 }
 0x15f   : > { %v4180_v29 = vpop.permute.xlu0 %947  ;;  %v1074_v56 = vpop.permute.xlu1 %1073 }
 0x160   : > { %v1768_v63 = vsel %vm1755_vm5, %v1735_v39, %v1074_v56  ;;  %v4267_v56 = vld [vmem:[#allocation2 + $0x128] sm:$0xff]  ;;  %v1736_v18 = vsel %vm1722_vm4, %v1703_v6, %v4180_v29 }
 0x161   : > { %1215 = vrot.lane.b32.xlu0 %v618_v42, %s3500_s14  ;;  %1341 = vrot.lane.b32.xlu1 %v4176_v9, %s3501_s25 }
 0x163   : > { %v1456_v11 = vpop.permute.xlu0 %1455  ;;  %v1582_v12 = vpop.permute.xlu1 %1581 }
 0x164   : > { %v1898_v19 = vsel %vm1887_vm9, %v1865_v16, %v1582_v12  ;;  %v1866_v10 = vsel %vm1854_vm8, %v1833_v62, %v1456_v11 }
 0x165   : > { %835 = vrot.lane.b32.xlu0 %v618_v42, %s3496_s10  ;;  %961 = vrot.lane.b32.xlu1 %v4176_v9, %s3498_s12 }
 0x166   : > { %3162 = vmatprep.mubr.msk.f32.mxu0 %vm1932_vm10, %v1898_v19  ;;  %v590_v19 = vld [vmem:[#allocation2 + $0x129] sm:$0xff] }
 0x167   : > { %v4205_v0 = vpop.permute.xlu0 %693  ;;  %v1076_v26 = vpop.permute.xlu1 %1075 }
 0x168   : > { %v1769_v38 = vsel %vm1755_vm5, %v1736_v18, %v1076_v26 }
 0x169   : > { %1343 = vrot.lane.b32.xlu0 %v4201_v31, %s3501_s25  ;;  %1469 = vrot.lane.b32.xlu1 %v587_v32, %s3502_s8 }
 0x16b   : > { %v1202_v33 = vpop.permute.xlu0 %1201  ;;  %v1584_v23 = vpop.permute.xlu1 %1583 }
 0x16c   : > { %v1899_v15 = vsel %vm1887_vm9, %v1866_v10, %v1584_v23  ;;  %v1801_v59 = vsel %vm1788_vm6, %v1768_v63, %v1202_v33  ;;  %v1671_v23 = vsel %vm223_vm0, %v3899_v8, %v4205_v0  ;;  %v4319_v8 = vld [vmem:[%s4988_s2] ss:$0 sm:$0xff] }
 0x16d   : > { %963 = vrot.lane.b32.xlu0 %v4201_v31, %s3498_s12  ;;  %1089 = vrot.lane.b32.xlu1 %v587_v32, %s3499_s13 }
 0x16e   : > { %3163 = vmatmul.mubr.msk.f32.gmra.mrb[10].mxu0 %vm1932_vm10, %v1899_v15 }
 0x16f   : > { %v4219_v44 = vpop.permute.xlu0 %695  ;;  %v4221_v37 = vpop.permute.xlu1 %821 }
 0x170   : > { %v1704_v15 = vsel %vm1689_vm3, %v1671_v23, %v4221_v37  ;;  %v1672_v63 = vsel %vm223_vm0, %v3925_v25, %v4219_v44 }
 0x171   : > { %1471 = vrot.lane.b32.xlu0 %v588_v34, %s3502_s8  ;;  %1597 = vrot.lane.b32.xlu1 %v619_v41, %s3503_s17 }
 0x173   : > { %v1204_v28 = vpop.permute.xlu0 %1203  ;;  %v1330_v48 = vpop.permute.xlu1 %1329 }
 0x174   : > { %v1834_v40 = vsel %vm1821_vm7, %v1801_v59, %v1330_v48  ;;  %v1802_v60 = vsel %vm1788_vm6, %v1769_v38, %v1204_v28  ;;  %v623_v38 = vld [vmem:[#allocation2 + $0x13a] sm:$0xff] }
 0x175   : > { %709 = vrot.lane.b32.xlu0 %v587_v32, %s3497_s11  ;;  %1091 = vrot.lane.b32.xlu1 %v588_v34, %s3499_s13 }
 0x177   : > { %v4227_v24 = vpop.permute.xlu0 %823  ;;  %v4229_v5 = vpop.permute.xlu1 %949 }
 0x178   : > { %v1705_v20 = vsel %vm1689_vm3, %v1672_v63, %v4227_v24 }
 0x179   : > { %1217 = vrot.lane.b32.xlu0 %v619_v41, %s3500_s14  ;;  %1599 = vrot.lane.b32.xlu1 %v620_v47, %s3503_s17 }
 0x17b   : > { %v1332_v51 = vpop.permute.xlu0 %1331  ;;  %v1458_v52 = vpop.permute.xlu1 %1457 }
 0x17c   : > { %v1867_v2 = vsel %vm1854_vm8, %v1834_v40, %v1458_v52  ;;  %v1835_v57 = vsel %vm1821_vm7, %v1802_v60, %v1332_v51 }
 0x17d   : > { %711 = vrot.lane.b32.xlu0 %v588_v34, %s3497_s11  ;;  %837 = vrot.lane.b32.xlu1 %v619_v41, %s3496_s10  ;;  %v4308_v34 = vld [vmem:[#allocation2 + $0x138] sm:$0xff]  ;;  %v1737_v41 = vsel %vm1722_vm4, %v1704_v15, %v4229_v5 }
 0x17f   : > { %v4246_v22 = vpop.permute.xlu0 %951  ;;  %v1078_v42 = vpop.permute.xlu1 %1077 }
 0x180   : > { %v1770_v0 = vsel %vm1755_vm5, %v1737_v41, %v1078_v42 }
 0x181   : > { %1219 = vrot.lane.b32.xlu0 %v620_v47, %s3500_s14  ;;  %1345 = vrot.lane.b32.xlu1 %v4242_v58, %s3501_s25 }
 0x183   : > { %v1460_v46 = vpop.permute.xlu0 %1459  ;;  %v1586_v3 = vpop.permute.xlu1 %1585 }
 0x184   : > { %v1900_v4 = vsel %vm1887_vm9, %v1867_v2, %v1586_v3  ;;  %v1868_v16 = vsel %vm1854_vm8, %v1835_v57, %v1460_v46  ;;  %v4340_v2 = vld [vmem:[#allocation2 + $0x140] sm:$0xff]  ;;  %v1738_v3 = vsel %vm1722_vm4, %v1705_v20, %v4246_v22 }
 0x185   : > { %839 = vrot.lane.b32.xlu0 %v620_v47, %s3496_s10  ;;  %965 = vrot.lane.b32.xlu1 %v4242_v58, %s3498_s12  ;;  %v591_v46 = vld [vmem:[#allocation2 + $0x139] sm:$0xff] }
 0x186   : > { %3165 = vmatprep.mubr.msk.f32.mxu0 %vm1932_vm10, %v1900_v4 }
 0x187   : > { %v4271_v55 = vpop.permute.xlu0 %697  ;;  %v4273_v36 = vpop.permute.xlu1 %1079 }
 0x188   : > { %v1771_v4 = vsel %vm1755_vm5, %v1738_v3, %v4273_v36  ;;  %v592_v36 = vld [vmem:[#allocation2 + $0x141] sm:$0xff] }
 0x189   : > { %1347 = vrot.lane.b32.xlu0 %v4267_v56, %s3501_s25  ;;  %1473 = vrot.lane.b32.xlu1 %v589_v17, %s3502_s8 }
 0x18b   : > { %v1206_v11 = vpop.permute.xlu0 %1205  ;;  %v1588_v12 = vpop.permute.xlu1 %1587 }
 0x18c   : > { %v1901_v29 = vsel %vm1887_vm9, %v1868_v16, %v1588_v12  ;;  %v1803_v47 = vsel %vm1788_vm6, %v1770_v0, %v1206_v11  ;;  %v624_v12 = vld [vmem:[#allocation2 + $0x142] sm:$0xff] }
 0x18d   : > { %967 = vrot.lane.b32.xlu0 %v4267_v56, %s3498_s12  ;;  %1093 = vrot.lane.b32.xlu1 %v589_v17, %s3499_s13 }
 0x18e   : > { %3166 = vmatmul.mubr.msk.f32.gmra.mrb[12].mxu0 %vm1932_vm10, %v1901_v29 }
 0x18f   : > { %v4287_v30 = vpop.permute.xlu0 %699  ;;  %v4289_v32 = vpop.permute.xlu1 %825 }
 0x191   : > { %1475 = vrot.lane.b32.xlu0 %v590_v19, %s3502_s8  ;;  %1601 = vrot.lane.b32.xlu1 %v621_v21, %s3503_s17 }
 0x193   : > { %v1208_v45 = vpop.permute.xlu0 %1207  ;;  %v1334_v26 = vpop.permute.xlu1 %1333 }
 0x194   : > { %v1836_v37 = vsel %vm1821_vm7, %v1803_v47, %v1334_v26  ;;  %v1804_v24 = vsel %vm1788_vm6, %v1771_v4, %v1208_v45  ;;  %v1673_v26 = vsel %vm223_vm0, %v3966_v54, %v4271_v55  ;;  %v625_v4 = vld [vmem:[#allocation2 + $0x152] sm:$0xff] }
 0x195   : > { %713 = vrot.lane.b32.xlu0 %v589_v17, %s3497_s11  ;;  %1095 = vrot.lane.b32.xlu1 %v590_v19, %s3499_s13 }
 0x197   : > { %v4295_v14 = vpop.permute.xlu0 %827  ;;  %v4297_v62 = vpop.permute.xlu1 %953 }
 0x199   : > { %1221 = vrot.lane.b32.xlu0 %v621_v21, %s3500_s14  ;;  %1603 = vrot.lane.b32.xlu1 %v622_v61, %s3503_s17 }
 0x19b   : > { %v1336_v10 = vpop.permute.xlu0 %1335  ;;  %v1462_v33 = vpop.permute.xlu1 %1461 }
 0x19c   : > { %v1869_v52 = vsel %vm1854_vm8, %v1836_v37, %v1462_v33  ;;  %v1837_v22 = vsel %vm1821_vm7, %v1804_v24, %v1336_v10  ;;  %v4384_v10 = vld [vmem:[#allocation2 + $0x150] sm:$0xff] }
 0x19d   : > { %715 = vrot.lane.b32.xlu0 %v590_v19, %s3497_s11  ;;  %841 = vrot.lane.b32.xlu1 %v621_v21, %s3496_s10 }
 0x19f   : > { %v4312_v28 = vpop.permute.xlu0 %955  ;;  %v4314_v48 = vpop.permute.xlu1 %1081 }
 0x1a1   : > { %v3149_v50 = vpop.f32.mrb[0].mxu0  ;;  %1223 = vrot.lane.b32.xlu0 %v622_v61, %s3500_s14  ;;  %1349 = vrot.lane.b32.xlu1 %v4308_v34, %s3501_s25 }
 0x1a2   : > { %v2105_v5 = vadd.f32 %v3149_v50, %v4319_v8  ;;  %v2099_v51 = vpop.f32.mrb[1].mxu0 }
 0x1a3   : > { %v2100_v43 = vadd.f32 %v4319_v8, %v2099_v51  ;;  %v1464_v53 = vpop.permute.xlu0 %1463  ;;  %v1590_v39 = vpop.permute.xlu1 %1589  ;;  %v1674_v51 = vsel %vm223_vm0, %v3991_v13, %v4287_v30 }
 0x1a4   : > { %v1902_v42 = vsel %vm1887_vm9, %v1869_v52, %v1590_v39  ;;  %v2259_v40 = vmax.f32 %v2105_v5, 0.0  ;;  %v1870_v7 = vsel %vm1854_vm8, %v1837_v22, %v1464_v53  ;;  %v4412_v39 = vld [vmem:[#allocation2 + $0x158] sm:$0xff] }
 0x1a5   : > { %v2258_v59 = vmax.f32 %v2100_v43, 0.0  ;;  %843 = vrot.lane.b32.xlu0 %v622_v61, %s3496_s10  ;;  %969 = vrot.lane.b32.xlu1 %v4308_v34, %s3498_s12  ;;  %v1706_v61 = vsel %vm1689_vm3, %v1673_v26, %v4289_v32  ;;  %v1707_v43 = vsel %vm1689_vm3, %v1674_v51, %v4295_v14 }
 0x1a6   : > { %3168 = vmatprep.mubr.msk.f32.mxu0 %vm1932_vm10, %v1902_v42  ;;  %v1739_v33 = vsel %vm1722_vm4, %v1706_v61, %v4297_v62  ;;  %v593_v42 = vld [vmem:[#allocation2 + $0x151] sm:$0xff]  ;;  %v1740_v63 = vsel %vm1722_vm4, %v1707_v43, %v4312_v28 }
 0x1a7   : > { %3197 = vmatprep.mubr.msk.f32.mxu1 %vm1689_vm3, %v2258_v59  ;;  %v4345_v25 = vpop.permute.xlu0 %701  ;;  %v4347_v44 = vpop.permute.xlu1 %1083  ;;  %v1772_v41 = vsel %vm1755_vm5, %v1739_v33, %v4314_v48 }
 0x1a8   : > { %3198 = vmatmul.mubr.msk.f32.vlgmr.msra.gmra.mrb[0].mxu1 %vm1689_vm3, %v2259_v40  ;;  %v1773_v59 = vsel %vm1755_vm5, %v1740_v63, %v4347_v44  ;;  %v594_v44 = vld [vmem:[#allocation2 + $0x159] sm:$0xff] }
 0x1a9   : > { %1351 = vrot.lane.b32.xlu0 %v4340_v2, %s3501_s25  ;;  %1477 = vrot.lane.b32.xlu1 %v591_v46, %s3502_s8 }
 0x1ab   : > { %v1210_v6 = vpop.permute.xlu0 %1209  ;;  %v1592_v17 = vpop.permute.xlu1 %1591 }
 0x1ac   : > { %v1903_v18 = vsel %vm1887_vm9, %v1870_v7, %v1592_v17  ;;  %v1805_v54 = vsel %vm1788_vm6, %v1772_v41, %v1210_v6  ;;  %v626_v17 = vld [vmem:[#allocation2 + $0x15a] sm:$0xff] }
 0x1ad   : > { %971 = vrot.lane.b32.xlu0 %v4340_v2, %s3498_s12  ;;  %1097 = vrot.lane.b32.xlu1 %v591_v46, %s3499_s13 }
 0x1ae   : > { %3169 = vmatmul.mubr.msk.f32.gmra.mrb[14].mxu0 %vm1932_vm10, %v1903_v18 }
 0x1af   : > { %v4363_v60 = vpop.permute.xlu0 %703  ;;  %v4365_v57 = vpop.permute.xlu1 %829 }
 0x1b1   : > { %1479 = vrot.lane.b32.xlu0 %v592_v36, %s3502_s8  ;;  %1605 = vrot.lane.b32.xlu1 %v623_v38, %s3503_s17 }
 0x1b3   : > { %v1212_v16 = vpop.permute.xlu0 %1211  ;;  %v1338_v11 = vpop.permute.xlu1 %1337 }
 0x1b4   : > { %v1838_v32 = vsel %vm1821_vm7, %v1805_v54, %v1338_v11  ;;  %v1806_v14 = vsel %vm1788_vm6, %v1773_v59, %v1212_v16  ;;  %v1675_v11 = vsel %vm223_vm0, %v4034_v35, %v4345_v25  ;;  %v627_v59 = vld [vmem:[#allocation2 + $0x16a] sm:$0xff] }
 0x1b5   : > { %717 = vrot.lane.b32.xlu0 %v591_v46, %s3497_s11  ;;  %1099 = vrot.lane.b32.xlu1 %v592_v36, %s3499_s13 }
 0x1b7   : > { %v4371_v29 = vpop.permute.xlu0 %831  ;;  %v4373_v19 = vpop.permute.xlu1 %957 }
 0x1b9   : > { %1225 = vrot.lane.b32.xlu0 %v623_v38, %s3500_s14  ;;  %1607 = vrot.lane.b32.xlu1 %v624_v12, %s3503_s17 }
 0x1bb   : > { %v1340_v21 = vpop.permute.xlu0 %1339  ;;  %v1466_v45 = vpop.permute.xlu1 %1465 }
 0x1bc   : > { %v1871_v47 = vsel %vm1854_vm8, %v1838_v32, %v1466_v45  ;;  %v1839_v28 = vsel %vm1821_vm7, %v1806_v14, %v1340_v21  ;;  %v4456_v21 = vld [vmem:[#allocation2 + $0x168] sm:$0xff] }
 0x1bd   : > { %719 = vrot.lane.b32.xlu0 %v592_v36, %s3497_s11  ;;  %845 = vrot.lane.b32.xlu1 %v623_v38, %s3496_s10 }
 0x1bf   : > { %v4388_v23 = vpop.permute.xlu0 %959  ;;  %v4390_v15 = vpop.permute.xlu1 %1085 }
 0x1c1   : > { %v3152_v55 = vpop.f32.mrb[2].mxu0  ;;  %1227 = vrot.lane.b32.xlu0 %v624_v12, %s3500_s14  ;;  %1353 = vrot.lane.b32.xlu1 %v4384_v10, %s3501_s25 }
 0x1c2   : > { %v2115_v0 = vadd.f32 %v3152_v55, %v4319_v8  ;;  %v2109_v62 = vpop.f32.mrb[3].mxu0 }
 0x1c3   : > { %v2110_v50 = vadd.f32 %v4319_v8, %v2109_v62  ;;  %v1468_v37 = vpop.permute.xlu0 %1467  ;;  %v1594_v5 = vpop.permute.xlu1 %1593  ;;  %v1676_v62 = vsel %vm223_vm0, %v4064_v1, %v4363_v60 }
 0x1c4   : > { %v1904_v48 = vsel %vm1887_vm9, %v1871_v47, %v1594_v5  ;;  %v2261_v53 = vmax.f32 %v2115_v0, 0.0  ;;  %v1872_v20 = vsel %vm1854_vm8, %v1839_v28, %v1468_v37  ;;  %v4484_v5 = vld [vmem:[#allocation2 + $0x170] sm:$0xff] }
 0x1c5   : > { %v2260_v52 = vmax.f32 %v2110_v50, 0.0  ;;  %847 = vrot.lane.b32.xlu0 %v624_v12, %s3496_s10  ;;  %973 = vrot.lane.b32.xlu1 %v4384_v10, %s3498_s12  ;;  %v1708_v12 = vsel %vm1689_vm3, %v1675_v11, %v4365_v57  ;;  %v1709_v50 = vsel %vm1689_vm3, %v1676_v62, %v4371_v29 }
 0x1c6   : > { %3171 = vmatprep.mubr.msk.f32.mxu0 %vm1932_vm10, %v1904_v48  ;;  %v1741_v45 = vsel %vm1722_vm4, %v1708_v12, %v4373_v19  ;;  %v595_v48 = vld [vmem:[#allocation2 + $0x169] sm:$0xff]  ;;  %v1742_v51 = vsel %vm1722_vm4, %v1709_v50, %v4388_v23 }
 0x1c7   : > { %3200 = vmatprep.mubr.msk.f32.mxu1 %vm1689_vm3, %v2260_v52  ;;  %v4417_v13 = vpop.permute.xlu0 %705  ;;  %v4419_v30 = vpop.permute.xlu1 %1087  ;;  %v1774_v33 = vsel %vm1755_vm5, %v1741_v45, %v4390_v15 }
 0x1c8   : > { %3201 = vmatmul.mubr.msk.f32.gmra.mrb[2].mxu1 %vm1689_vm3, %v2261_v53  ;;  %v1775_v52 = vsel %vm1755_vm5, %v1742_v51, %v4419_v30  ;;  %v596_v30 = vld [vmem:[#allocation2 + $0x171] sm:$0xff] }
 0x1c9   : > { %1355 = vrot.lane.b32.xlu0 %v4412_v39, %s3501_s25  ;;  %1481 = vrot.lane.b32.xlu1 %v593_v42, %s3502_s8 }
 0x1cb   : > { %v1214_v40 = vpop.permute.xlu0 %1213  ;;  %v1596_v46 = vpop.permute.xlu1 %1595 }
 0x1cc   : > { %v1905_v3 = vsel %vm1887_vm9, %v1872_v20, %v1596_v46  ;;  %v1807_v35 = vsel %vm1788_vm6, %v1774_v33, %v1214_v40  ;;  %v628_v46 = vld [vmem:[#allocation2 + $0x172] sm:$0xff] }
 0x1cd   : > { %975 = vrot.lane.b32.xlu0 %v4412_v39, %s3498_s12  ;;  %1101 = vrot.lane.b32.xlu1 %v593_v42, %s3499_s13 }
 0x1ce   : > { %3172 = vmatmul.mubr.msk.f32.gmra.mrb[16].mxu0 %vm1932_vm10, %v1905_v3 }
 0x1cf   : > { %v4435_v24 = vpop.permute.xlu0 %707  ;;  %v4437_v22 = vpop.permute.xlu1 %833 }
 0x1d1   : > { %1483 = vrot.lane.b32.xlu0 %v594_v44, %s3502_s8  ;;  %1609 = vrot.lane.b32.xlu1 %v625_v4, %s3503_s17 }
 0x1d3   : > { %v1216_v7 = vpop.permute.xlu0 %1215  ;;  %v1342_v6 = vpop.permute.xlu1 %1341 }
 0x1d4   : > { %v1840_v57 = vsel %vm1821_vm7, %v1807_v35, %v1342_v6  ;;  %v1808_v29 = vsel %vm1788_vm6, %v1775_v52, %v1216_v7  ;;  %v1677_v6 = vsel %vm223_vm0, %v4108_v27, %v4417_v13  ;;  %v629_v52 = vld [vmem:[#allocation2 + $0x182] sm:$0xff] }
 0x1d5   : > { %721 = vrot.lane.b32.xlu0 %v593_v42, %s3497_s11  ;;  %1103 = vrot.lane.b32.xlu1 %v594_v44, %s3499_s13 }
 0x1d7   : > { %v4443_v18 = vpop.permute.xlu0 %835  ;;  %v4445_v36 = vpop.permute.xlu1 %961 }
 0x1d9   : > { %1229 = vrot.lane.b32.xlu0 %v625_v4, %s3500_s14  ;;  %1611 = vrot.lane.b32.xlu1 %v626_v17, %s3503_s17 }
 0x1db   : > { %v1344_v38 = vpop.permute.xlu0 %1343  ;;  %v1470_v16 = vpop.permute.xlu1 %1469 }
 0x1dc   : > { %v1873_v54 = vsel %vm1854_vm8, %v1840_v57, %v1470_v16  ;;  %v1841_v23 = vsel %vm1821_vm7, %v1808_v29, %v1344_v38  ;;  %v565_v38 = vld [vmem:[#allocation2 + $0x180] sm:$0xff] }
 0x1dd   : > { %723 = vrot.lane.b32.xlu0 %v594_v44, %s3497_s11  ;;  %849 = vrot.lane.b32.xlu1 %v625_v4, %s3496_s10 }
 0x1df   : > { %v4460_v26 = vpop.permute.xlu0 %963  ;;  %v4462_v61 = vpop.permute.xlu1 %1089 }
 0x1e1   : > { %v3155_v25 = vpop.f32.mrb[4].mxu0  ;;  %1231 = vrot.lane.b32.xlu0 %v626_v17, %s3500_s14  ;;  %1357 = vrot.lane.b32.xlu1 %v4456_v21, %s3501_s25 }
 0x1e2   : > { %v2125_v41 = vadd.f32 %v3155_v25, %v4319_v8  ;;  %v2119_v19 = vpop.f32.mrb[5].mxu0 }
 0x1e3   : > { %v2120_v55 = vadd.f32 %v4319_v8, %v2119_v19  ;;  %v1472_v32 = vpop.permute.xlu0 %1471  ;;  %v1598_v0 = vpop.permute.xlu1 %1597  ;;  %v1678_v19 = vsel %vm223_vm0, %v4134_v49, %v4435_v24 }
 0x1e4   : > { %v1906_v15 = vsel %vm1887_vm9, %v1873_v54, %v1598_v0  ;;  %v2263_v37 = vmax.f32 %v2125_v41, 0.0  ;;  %v1874_v43 = vsel %vm1854_vm8, %v1841_v23, %v1472_v32  ;;  %v566_v0 = vld [vmem:[#allocation2 + $0x188] sm:$0xff] }
 0x1e5   : > { %v2262_v47 = vmax.f32 %v2120_v55, 0.0  ;;  %851 = vrot.lane.b32.xlu0 %v626_v17, %s3496_s10  ;;  %977 = vrot.lane.b32.xlu1 %v4456_v21, %s3498_s12  ;;  %v1710_v17 = vsel %vm1689_vm3, %v1677_v6, %v4437_v22  ;;  %v1711_v55 = vsel %vm1689_vm3, %v1678_v19, %v4443_v18  ;;  %v599_v6 = vld [vmem:[#allocation2 + $0x199] sm:$0xff] }
 0x1e6   : > { %3174 = vmatprep.mubr.msk.f32.mxu0 %vm1932_vm10, %v1906_v15  ;;  %v1743_v16 = vsel %vm1722_vm4, %v1710_v17, %v4445_v36  ;;  %v597_v15 = vld [vmem:[#allocation2 + $0x181] sm:$0xff]  ;;  %v1744_v62 = vsel %vm1722_vm4, %v1711_v55, %v4460_v26 }
 0x1e7   : > { %3203 = vmatprep.mubr.msk.f32.mxu1 %vm1689_vm3, %v2262_v47  ;;  %v4489_v1 = vpop.permute.xlu0 %709  ;;  %v4491_v60 = vpop.permute.xlu1 %1091  ;;  %v1776_v45 = vsel %vm1755_vm5, %v1743_v16, %v4462_v61  ;;  %v600_v17 = vld [vmem:[#allocation2 + $0x1a1] sm:$0xff] }
 0x1e8   : > { %3204 = vmatmul.mubr.msk.f32.gmra.mrb[4].mxu1 %vm1689_vm3, %v2263_v37  ;;  %v1777_v24 = vsel %vm1755_vm5, %v1744_v62, %v4491_v60  ;;  %v598_v60 = vld [vmem:[#allocation2 + $0x189] sm:$0xff] }
 0x1e9   : > { %1359 = vrot.lane.b32.xlu0 %v4484_v5, %s3501_s25  ;;  %1485 = vrot.lane.b32.xlu1 %v595_v48, %s3502_s8 }
 0x1eb   : > { %v1218_v53 = vpop.permute.xlu0 %1217  ;;  %v1600_v42 = vpop.permute.xlu1 %1599 }
 0x1ec   : > { %v1907_v63 = vsel %vm1887_vm9, %v1874_v43, %v1600_v42  ;;  %v1809_v27 = vsel %vm1788_vm6, %v1776_v45, %v1218_v53  ;;  %v630_v42 = vld [vmem:[#allocation2 + $0x18a] sm:$0xff] }
 0x1ed   : > { %979 = vrot.lane.b32.xlu0 %v4484_v5, %s3498_s12  ;;  %1105 = vrot.lane.b32.xlu1 %v595_v48, %s3499_s13 }
 0x1ee   : > { %3175 = vmatmul.mubr.msk.f32.gmra.mrb[18].mxu0 %vm1932_vm10, %v1907_v63 }
 0x1ef   : > { %v4507_v14 = vpop.permute.xlu0 %711  ;;  %v4509_v28 = vpop.permute.xlu1 %837 }
 0x1f1   : > { %1487 = vrot.lane.b32.xlu0 %v596_v30, %s3502_s8  ;;  %1613 = vrot.lane.b32.xlu1 %v627_v59, %s3503_s17 }
 0x1f3   : > { %v1220_v20 = vpop.permute.xlu0 %1219  ;;  %v1346_v40 = vpop.permute.xlu1 %1345 }
 0x1f4   : > { %v1842_v22 = vsel %vm1821_vm7, %v1809_v27, %v1346_v40  ;;  %v1810_v18 = vsel %vm1788_vm6, %v1777_v24, %v1220_v20  ;;  %v568_v20 = vld [vmem:[#allocation2 + $0x1a0] sm:$0xff] }
 0x1f5   : > { %725 = vrot.lane.b32.xlu0 %v595_v48, %s3497_s11  ;;  %1107 = vrot.lane.b32.xlu1 %v596_v30, %s3499_s13 }
 0x1f7   : > { %v4515_v3 = vpop.permute.xlu0 %839  ;;  %v4517_v44 = vpop.permute.xlu1 %965 }
 0x1f9   : > { %1233 = vrot.lane.b32.xlu0 %v627_v59, %s3500_s14  ;;  %1615 = vrot.lane.b32.xlu1 %v628_v46, %s3503_s17 }
 0x1fb   : > { %v1348_v4 = vpop.permute.xlu0 %1347  ;;  %v1474_v7 = vpop.permute.xlu1 %1473 }
 0x1fc   : > { %v1875_v36 = vsel %vm1854_vm8, %v1842_v22, %v1474_v7  ;;  %v1843_v50 = vsel %vm1821_vm7, %v1810_v18, %v1348_v4  ;;  %v1679_v4 = vsel %vm223_vm0, %v4176_v9, %v4489_v1 }
 0x1fd   : > { %727 = vrot.lane.b32.xlu0 %v596_v30, %s3497_s11  ;;  %853 = vrot.lane.b32.xlu1 %v627_v59, %s3496_s10  ;;  %v567_v59 = vld [vmem:[#allocation2 + $0x198] sm:$0xff]  ;;  %v1712_v7 = vsel %vm1689_vm3, %v1679_v4, %v4509_v28  ;;  %s3437_s11 = scalar_lea.vmem %s3436_s30, 8192 }
 0x1ff   : > { %v4530_v11 = vpop.permute.xlu0 %967  ;;  %v4532_v12 = vpop.permute.xlu1 %1093 }
 0x201   : > { %v3158_v13 = vpop.f32.mrb[6].mxu0  ;;  %1235 = vrot.lane.b32.xlu0 %v628_v46, %s3500_s14  ;;  %1361 = vrot.lane.b32.xlu1 %v565_v38, %s3501_s25 }
 0x202   : > { %v2135_v33 = vadd.f32 %v3158_v13, %v4319_v8  ;;  %v2129_v35 = vpop.f32.mrb[7].mxu0 }
 0x203   : > { %v2130_v25 = vadd.f32 %v4319_v8, %v2129_v35  ;;  %v1476_v57 = vpop.permute.xlu0 %1475  ;;  %v1602_v41 = vpop.permute.xlu1 %1601 }
 0x204   : > { %v1908_v61 = vsel %vm1887_vm9, %v1875_v36, %v1602_v41  ;;  %v2265_v32 = vmax.f32 %v2135_v33, 0.0  ;;  %v1876_v26 = vsel %vm1854_vm8, %v1843_v50, %v1476_v57  ;;  %v631_v33 = vld [vmem:[#allocation2 + $0x19a] sm:$0xff]  ;;  %v1680_v41 = vsel %vm223_vm0, %v4201_v31, %v4507_v14 }
 0x205   : > { %v2264_v54 = vmax.f32 %v2130_v25, 0.0  ;;  %855 = vrot.lane.b32.xlu0 %v628_v46, %s3496_s10  ;;  %981 = vrot.lane.b32.xlu1 %v565_v38, %s3498_s12  ;;  %v1745_v38 = vsel %vm1722_vm4, %v1712_v7, %v4517_v44  ;;  %v632_v44 = vld [vmem:[#allocation2 + $0x1a2] sm:$0xff]  ;;  %v1713_v19 = vsel %vm1689_vm3, %v1680_v41, %v4515_v3 }
 0x206   : > { %3177 = vmatprep.mubr.msk.f32.mxu0 %vm1932_vm10, %v1908_v61  ;;  %v1778_v27 = vsel %vm1755_vm5, %v1745_v38, %v4532_v12  ;;  %v1746_v55 = vsel %vm1722_vm4, %v1713_v19, %v4530_v11 }
 0x207   : > { %3206 = vmatprep.mubr.msk.f32.mxu1 %vm1689_vm3, %v2264_v54  ;;  %v4555_v47 = vpop.permute.xlu0 %713  ;;  %v4557_v49 = vpop.permute.xlu1 %1095 }
 0x208   : > { %3207 = vmatmul.mubr.msk.f32.gmra.mrb[6].mxu1 %vm1689_vm3, %v2265_v32  ;;  %v1779_v31 = vsel %vm1755_vm5, %v1746_v55, %v4557_v49 }
 0x209   : > { %1363 = vrot.lane.b32.xlu0 %v566_v0, %s3501_s25  ;;  %1489 = vrot.lane.b32.xlu1 %v597_v15, %s3502_s8 }
 0x20b   : > { %v1222_v37 = vpop.permute.xlu0 %1221  ;;  %v1604_v48 = vpop.permute.xlu1 %1603 }
 0x20c   : > { %v1909_v51 = vsel %vm1887_vm9, %v1876_v26, %v1604_v48  ;;  %v1811_v9 = vsel %vm1788_vm6, %v1778_v27, %v1222_v37 }
 0x20d   : > { %983 = vrot.lane.b32.xlu0 %v566_v0, %s3498_s12  ;;  %1109 = vrot.lane.b32.xlu1 %v597_v15, %s3499_s13 }
 0x20e   : > { %3178 = vmatmul.mubr.msk.f32.gmra.mrb[20].mxu0 %vm1932_vm10, %v1909_v51 }
 0x20f   : > { %v4571_v29 = vpop.permute.xlu0 %715  ;;  %v4573_v23 = vpop.permute.xlu1 %841 }
 0x210   : > { %v1682_v38 = vsel %vm223_vm0, %v4267_v56, %v4571_v29 }
 0x211   : > { %1491 = vrot.lane.b32.xlu0 %v598_v60, %s3502_s8  ;;  %1617 = vrot.lane.b32.xlu1 %v629_v52, %s3503_s17 }
 0x213   : > { %v1224_v43 = vpop.permute.xlu0 %1223  ;;  %v1350_v53 = vpop.permute.xlu1 %1349 }
 0x214   : > { %v1844_v28 = vsel %vm1821_vm7, %v1811_v9, %v1350_v53  ;;  %v1812_v14 = vsel %vm1788_vm6, %v1779_v31, %v1224_v43 }
 0x215   : > { %1111 = vrot.lane.b32.xlu0 %v598_v60, %s3499_s13  ;;  %1237 = vrot.lane.b32.xlu1 %v629_v52, %s3500_s14  ;;  %v1681_v52 = vsel %vm223_vm0, %v4242_v58, %v4555_v47  ;;  %s215_s13 = sand.u32 1, %s3485_s19  }
 0x216   : > { %v1714_v43 = vsel %vm1689_vm3, %v1681_v52, %v4573_v23 }
 0x217   : > { %v4579_v63 = vpop.permute.xlu0 %843  ;;  %v970_v30 = vpop.permute.xlu1 %969 }
 0x218   : > { %v1747_v53 = vsel %vm1722_vm4, %v1714_v43, %v970_v30  ;;  %v1715_v27 = vsel %vm1689_vm3, %v1682_v38, %v4579_v63 }
 0x219   : > { %1619 = vrot.lane.b32.xlu0 %v630_v42, %s3503_s17  ;;  %1239 = vrot.lane.b32.xlu1 %v630_v42, %s3500_s14  ;;  %s2958_s14 = sshll.u32 %s215_s13, 8 }
 0x21b   : > { %v1352_v40 = vpop.permute.xlu0 %1351  ;;  %v1478_v46 = vpop.permute.xlu1 %1477 }
 0x21c   : > { %v1877_v35 = vsel %vm1854_vm8, %v1844_v28, %v1478_v46  ;;  %v1845_v15 = vsel %vm1821_vm7, %v1812_v14, %v1352_v40 }
 0x21d   : > { %1365 = vrot.lane.b32.xlu0 %v567_v59, %s3501_s25  ;;  %1367 = vrot.lane.b32.xlu1 %v568_v20, %s3501_s25  ;;  %s4766_s25 = scalar_lea.vmem [#allocation3], %s2958_s14 }
 0x21e   : > { %s2892_s15 = sshll.u32 %s4766_s25, 4  ;;  %s4936_s15 = int_to_ptr.vmem [resolvable:$true] %s2892_s15 }
 0x21f   : > { %v4592_v16 = vpop.permute.xlu0 %971  ;;  %v1098_v45 = vpop.permute.xlu1 %1097  ;;  %s3431_s26 = scalar_lea.vmem %s4936_s15, 4096  ;;  %p3438_p0 = scmp.lt.s32.totalorder %s4936_s15, %s3436_s30 }
 0x220   : > { %v1780_v20 = vsel %vm1755_vm5, %v1747_v53, %v1098_v45  ;;  %p3432_p11 = scmp.ne.s32.totalorder %s4936_s15, %s3431_s26  ;;  %p3439_p1 = scmp.lt.s32.totalorder %s3437_s11, %s3431_s26 }
 0x221   : > { %v3161_v1 = vpop.f32.mrb[8].mxu0  ;;  %1493 = vrot.lane.b32.xlu0 %v599_v6, %s3502_s8  ;;  %1495 = vrot.lane.b32.xlu1 %v600_v17, %s3502_s8  ;;  %s3066_s8 = sshll.u32 %s3557_s22, 12  ;;  %s4944_s22 = scalar_lea.sflag [#allocation4], %s215_s13 }
 0x222   : > { %v2145_v13 = vadd.f32 %v3161_v1, %v4319_v8  ;;  %v2139_v22 = vpop.f32.mrb[9].mxu0  ;;  %v1748_v1 = vsel %vm1722_vm4, %v1715_v27, %v4592_v16  ;;  %s4932_s23 = scalar_lea.hbm %s4991_s5, %s3066_s8  ;;  %p3433_p12 = pnand %p3432_p11, %p3574_p5 }
 0x223   : > { %v2140_v36 = vadd.f32 %v4319_v8, %v2139_v22  ;;  %v1480_v25 = vpop.permute.xlu0 %1479  ;;  %v1606_v12 = vpop.permute.xlu1 %1605  ;;  %p3440_p2 = por %p3439_p1, %p3438_p0 }
 0x224   : > { %v1910_v57 = vsel %vm1887_vm9, %v1877_v35, %v1606_v12  ;;  %v2267_v54 = vmax.f32 %v2145_v13, 0.0  ;;  %v1878_v3 = vsel %vm1854_vm8, %v1845_v15, %v1480_v25  ;;  %p3434_p13 = pneg %p3433_p12 }
 0x225   : > { %v2266_v61 = vmax.f32 %v2140_v36, 0.0  ;;  %1621 = vrot.lane.b32.xlu0 %v631_v33, %s3503_s17  ;;  %1623 = vrot.lane.b32.xlu1 %v632_v44, %s3503_s17 }
 0x226   : > { %3180 = vmatprep.mubr.msk.f32.mxu0 %vm1932_vm10, %v1910_v57  ;;  %p3441_p3 = pnand %p3440_p2, %p3434_p13 }
 0x227   : > { %3209 = vmatprep.mubr.msk.f32.mxu1 %vm1689_vm3, %v2266_v61  ;;  %v718_v32 = vpop.permute.xlu0 %717  ;;  %v1100_v0 = vpop.permute.xlu1 %1099 }
 0x228   : > { %3210 = vmatmul.mubr.msk.f32.gmra.mrb[8].mxu1 %vm1689_vm3, %v2267_v54  ;;  %v1781_v22 = vsel %vm1755_vm5, %v1748_v1, %v1100_v0  ;;  %v1683_v54 = vsel %vm223_vm0, %v4308_v34, %v718_v32 }
 0x22b   : > { %v1226_v62 = vpop.permute.xlu0 %1225  ;;  %v1608_v24 = vpop.permute.xlu1 %1607 }
 0x22c   : > { %v1911_v18 = vsel %vm1887_vm9, %v1878_v3, %v1608_v24  ;;  %v1813_v40 = vsel %vm1788_vm6, %v1780_v20, %v1226_v62 }
 0x22d   : > { %3181 = vmatmul.mubr.msk.f32.gmra.mrb[22].mxu0 %vm1932_vm10, %v1911_v18 }
 0x22f   : > { %v4623_v11 = vpop.permute.xlu0 %719  ;;  %v846_v50 = vpop.permute.xlu1 %845 }
 0x230   : > { %v1716_v55 = vsel %vm1689_vm3, %v1683_v54, %v846_v50 }
 0x233   : > { %v1228_v26 = vpop.permute.xlu0 %1227  ;;  %v1354_v37 = vpop.permute.xlu1 %1353 }
 0x234   : > { %v1846_v4 = vsel %vm1821_vm7, %v1813_v40, %v1354_v37  ;;  %v1814_v56 = vsel %vm1788_vm6, %v1781_v22, %v1228_v26 }
 0x237   : > { %v4625_v49 = vpop.permute.xlu0 %847  ;;  %v974_v48 = vpop.permute.xlu1 %973 }
 0x238   : > { %v1749_v0 = vsel %vm1722_vm4, %v1716_v55, %v974_v48 }
 0x23b   : > { %v1356_v51 = vpop.permute.xlu0 %1355  ;;  %v1482_v60 = vpop.permute.xlu1 %1481 }
 0x23c   : > { %v1879_v17 = vsel %vm1854_vm8, %v1846_v4, %v1482_v60  ;;  %v1847_v29 = vsel %vm1821_vm7, %v1814_v56, %v1356_v51  ;;  %v1684_v51 = vsel %vm223_vm0, %v4340_v2, %v4623_v11 }
 0x23d   : > { %v1717_v52 = vsel %vm1689_vm3, %v1684_v51, %v4625_v49 }
 0x23f   : > { %v976_v42 = vpop.permute.xlu0 %975  ;;  %v1102_v59 = vpop.permute.xlu1 %1101 }
 0x240   : > { %v1782_v15 = vsel %vm1755_vm5, %v1749_v0, %v1102_v59  ;;  %v1750_v53 = vsel %vm1722_vm4, %v1717_v52, %v976_v42  ;;  %v2619_v52 = vlaneseq }
 0x241   : > { %v3164_v46 = vpop.f32.mrb[10].mxu0 }
 0x242   : > { %v2155_v7 = vadd.f32 %v3164_v46, %v4319_v8  ;;  %v2149_v6 = vpop.f32.mrb[11].mxu0 }
 0x243   : > { %v2150_v58 = vadd.f32 %v4319_v8, %v2149_v6  ;;  %v1484_v47 = vpop.permute.xlu0 %1483  ;;  %v1610_v23 = vpop.permute.xlu1 %1609 }
 0x244   : > { %v1912_v30 = vsel %vm1887_vm9, %v1879_v17, %v1610_v23  ;;  %v2269_v9 = vmax.f32 %v2155_v7, 0.0  ;;  %v1880_v33 = vsel %vm1854_vm8, %v1847_v29, %v1484_v47 }
 0x245   : > { %v2268_v45 = vmax.f32 %v2150_v58, 0.0  ;;  %3183 = vmatprep.mubr.msk.f32.mxu0 %vm1932_vm10, %v1912_v30  ;;  %v4699_v30 = vld [vmem:[%s4990_s4] ss:$0 sm:$0xff] }
 0x247   : > { %3212 = vmatprep.mubr.msk.f32.mxu1 %vm1689_vm3, %v2268_v45  ;;  %v4649_v28 = vpop.permute.xlu0 %721  ;;  %v1104_v13 = vpop.permute.xlu1 %1103 }
 0x248   : > { %3213 = vmatmul.mubr.msk.f32.gmra.mrb[10].mxu1 %vm1689_vm3, %v2269_v9  ;;  %v1783_v40 = vsel %vm1755_vm5, %v1750_v53, %v1104_v13  ;;  %v1685_v22 = vsel %vm223_vm0, %v4384_v10, %v4649_v28 }
 0x24b   : > { %v1230_v63 = vpop.permute.xlu0 %1229  ;;  %v1612_v44 = vpop.permute.xlu1 %1611 }
 0x24c   : > { %v1913_v35 = vsel %vm1887_vm9, %v1880_v33, %v1612_v44  ;;  %v1815_v3 = vsel %vm1788_vm6, %v1782_v15, %v1230_v63 }
 0x24d   : > { %3184 = vmatmul.mubr.msk.f32.gmra.mrb[24].mxu0 %vm1932_vm10, %v1913_v35 }
 0x24f   : > { %v4658_v16 = vpop.permute.xlu0 %723  ;;  %v850_v36 = vpop.permute.xlu1 %849 }
 0x250   : > { %v1718_v29 = vsel %vm1689_vm3, %v1685_v22, %v850_v36 }
 0x253   : > { %v1232_v25 = vpop.permute.xlu0 %1231  ;;  %v1358_v12 = vpop.permute.xlu1 %1357 }
 0x254   : > { %v1848_v24 = vsel %vm1821_vm7, %v1815_v3, %v1358_v12  ;;  %v1816_v2 = vsel %vm1788_vm6, %v1783_v40, %v1232_v25  ;;  %v4741_v40 = vand.u32 127, %v2619_v52 }
 0x256   : > { %vm2621_vm11 = vcmp.ge.s32.totalorder %v4741_v40, 45 }
 0x257   : > { %v4660_v57 = vpop.permute.xlu0 %851  ;;  %v978_v41 = vpop.permute.xlu1 %977 }
 0x258   : > { %v1751_v44 = vsel %vm1722_vm4, %v1718_v29, %v978_v41  ;;  %v1686_v41 = vsel %vm223_vm0, %v4412_v39, %v4658_v16 }
 0x259   : > { %v1719_v3 = vsel %vm1689_vm3, %v1686_v41, %v4660_v57 }
 0x25b   : > { %v1360_v61 = vpop.permute.xlu0 %1359  ;;  %v1486_v19 = vpop.permute.xlu1 %1485 }
 0x25c   : > { %v1881_v37 = vsel %vm1854_vm8, %v1848_v24, %v1486_v19  ;;  %v1849_v11 = vsel %vm1821_vm7, %v1816_v2, %v1360_v61 }
 0x25f   : > { %v4666_v31 = vpop.permute.xlu0 %979  ;;  %v1106_v14 = vpop.permute.xlu1 %1105 }
 0x260   : > { %v1784_v25 = vsel %vm1755_vm5, %v1751_v44, %v1106_v14  ;;  %v1752_v24 = vsel %vm1722_vm4, %v1719_v3, %v4666_v31 }
 0x261   : > { %v3167_v62 = vpop.f32.mrb[12].mxu0 }
 0x262   : > { %v2165_v18 = vadd.f32 %v3167_v62, %v4319_v8  ;;  %v2159_v26 = vpop.f32.mrb[13].mxu0 }
 0x263   : > { %v2160_v34 = vadd.f32 %v4319_v8, %v2159_v26  ;;  %v1488_v32 = vpop.permute.xlu0 %1487  ;;  %v1614_v50 = vpop.permute.xlu1 %1613 }
 0x264   : > { %v1914_v48 = vsel %vm1887_vm9, %v1881_v37, %v1614_v50  ;;  %v2271_v43 = vmax.f32 %v2165_v18, 0.0  ;;  %v1882_v46 = vsel %vm1854_vm8, %v1849_v11, %v1488_v32 }
 0x265   : > { %v2270_v60 = vmax.f32 %v2160_v34, 0.0  ;;  %3186 = vmatprep.mubr.msk.f32.mxu0 %vm1932_vm10, %v1914_v48 }
 0x267   : > { %3215 = vmatprep.mubr.msk.f32.mxu1 %vm1689_vm3, %v2270_v60  ;;  %v4683_v59 = vpop.permute.xlu0 %725  ;;  %v1108_v20 = vpop.permute.xlu1 %1107 }
 0x268   : > { %3216 = vmatmul.mubr.msk.f32.gmra.mrb[12].mxu1 %vm1689_vm3, %v2271_v43  ;;  %v1785_v26 = vsel %vm1755_vm5, %v1752_v24, %v1108_v20  ;;  %v1687_v20 = vsel %vm223_vm0, %v4456_v21, %v4683_v59 }
 0x26b   : > { %v1234_v4 = vpop.permute.xlu0 %1233  ;;  %v1616_v49 = vpop.permute.xlu1 %1615 }
 0x26c   : > { %v1915_v7 = vsel %vm1887_vm9, %v1882_v46, %v1616_v49  ;;  %v1817_v61 = vsel %vm1788_vm6, %v1784_v25, %v1234_v4 }
 0x26d   : > { %3187 = vmatmul.mubr.msk.f32.gmra.mrb[26].mxu0 %vm1932_vm10, %v1915_v7 }
 0x26f   : > { %v4692_v42 = vpop.permute.xlu0 %727  ;;  %v4694_v6 = vpop.permute.xlu1 %853 }
 0x270   : > { %v1688_v2 = vsel %vm223_vm0, %v4484_v5, %v4692_v42  ;;  %v1720_v11 = vsel %vm1689_vm3, %v1687_v20, %v4694_v6 }
 0x273   : > { %v1236_v17 = vpop.permute.xlu0 %1235  ;;  %v1362_v58 = vpop.permute.xlu1 %1361 }
 0x274   : > { %v1850_v28 = vsel %vm1821_vm7, %v1817_v61, %v1362_v58  ;;  %v1818_v39 = vsel %vm1788_vm6, %v1785_v26, %v1236_v17 }
 0x277   : > { %v856_v47 = vpop.permute.xlu0 %855  ;;  %v982_v23 = vpop.permute.xlu1 %981 }
 0x278   : > { %v1721_v46 = vsel %vm1689_vm3, %v1688_v2, %v856_v47  ;;  %v1753_v4 = vsel %vm1722_vm4, %v1720_v11, %v982_v23 }
 0x27b   : > { %v3199_v38 = vpop.f32.mrb[0].mxu1  ;;  %v1364_v45 = vpop.permute.xlu0 %1363 }
 0x27c   : > { %v4702_v27 = vadd.f32 %v3199_v38, %v4699_v30  ;;  %v2460_v9 = vpop.f32.mrb[1].mxu1  ;;  %v1490_v1 = vpop.permute.xlu1 %1489  ;;  %v1851_v57 = vsel %vm1821_vm7, %v1818_v39, %v1364_v45 }
 0x27d   : > { %v4705_v13 = vadd.f32 %v4699_v30, %v2460_v9  ;;  %v1883_v55 = vsel %vm1854_vm8, %v1850_v28, %v1490_v1 }
 0x27e   : > { %v3029_v56 = vmul.f32 -1.442695, %v4702_v27 }
 0x27f   : > { %v3028_v33 = vmul.f32 -1.442695, %v4705_v13  ;;  %v984_v63 = vpop.permute.xlu0 %983 }
 0x280   : > { %3302 = vpow2.f32 %v3029_v56  ;;  %v1110_v35 = vpop.permute.xlu1 %1109  ;;  %v1754_v7 = vsel %vm1722_vm4, %v1721_v46, %v984_v63 }
 0x281   : > { %3304 = vpow2.f32 %v3028_v33  ;;  %v3170_v12 = vpop.f32.mrb[14].mxu0  ;;  %v1786_v21 = vsel %vm1755_vm5, %v1753_v4, %v1110_v35 }
 0x282   : > { %v2175_v19 = vadd.f32 %v3170_v12, %v4319_v8  ;;  %v2169_v10 = vpop.f32.mrb[15].mxu0 }
 0x283   : > { %v2170_v36 = vadd.f32 %v4319_v8, %v2169_v10  ;;  %v1492_v54 = vpop.permute.xlu0 %1491 }
 0x284   : > { %v1618_v0 = vpop.permute.xlu1 %1617  ;;  %v2273_v62 = vmax.f32 %v2175_v19, 0.0  ;;  %v1884_v50 = vsel %vm1854_vm8, %v1851_v57, %v1492_v54 }
 0x285   : > { %v2272_v14 = vmax.f32 %v2170_v36, 0.0  ;;  %v1916_v15 = vsel %vm1887_vm9, %v1883_v55, %v1618_v0 }
 0x286   : > { %3189 = vmatprep.mubr.msk.f32.mxu0 %vm1932_vm10, %v1916_v15 }
 0x287   : > { %3218 = vmatprep.mubr.msk.f32.mxu1 %vm1689_vm3, %v2272_v14  ;;  %v1112_v18 = vpop.permute.xlu0 %1111 }
 0x288   : > { %v1238_v37 = vpop.permute.xlu1 %1237  ;;  %3219 = vmatmul.mubr.msk.f32.gmra.mrb[14].mxu1 %vm1689_vm3, %v2273_v62  ;;  %v1787_v17 = vsel %vm1755_vm5, %v1754_v7, %v1112_v18 }
 0x289   : > { %v1819_v5 = vsel %vm1788_vm6, %v1786_v21, %v1238_v37 }
 0x28a   : > { %v3303_v16 = vpop.eup %3302 }
 0x28b   : > { %v3305_v34 = vpop.eup %3304  ;;  %v2719_v32 = vadd.f32 1.0, %v3303_v16  ;;  %v1620_v48 = vpop.permute.xlu0 %1619 }
 0x28c   : > { %v2718_v31 = vadd.f32 1.0, %v3305_v34  ;;  %v1917_v51 = vsel %vm1887_vm9, %v1884_v50, %v1620_v48  ;;  %v1240_v60 = vpop.permute.xlu1 %1239 }
 0x28d   : > { %3306 = vrcp.f32 %v2719_v32  ;;  %3190 = vmatmul.mubr.msk.f32.gmra.mrb[28].mxu0 %vm1932_vm10, %v1917_v51  ;;  %v1820_v42 = vsel %vm1788_vm6, %v1787_v17, %v1240_v60  ;;  %v4805_v17 = vld [vmem:[%s4988_s2] ss:$0 sm:$0xff] }
 0x28e   : > { %3308 = vrcp.f32 %v2718_v31 }
 0x28f   : > { %v1366_v43 = vpop.permute.xlu0 %1365 }
 0x290   : > { %v1368_v53 = vpop.permute.xlu1 %1367  ;;  %v1852_v6 = vsel %vm1821_vm7, %v1819_v5, %v1366_v43 }
 0x291   : > { %v1853_v47 = vsel %vm1821_vm7, %v1820_v42, %v1368_v53 }
 0x293   : > { %v1494_v49 = vpop.permute.xlu0 %1493 }
 0x294   : > { %v1496_v59 = vpop.permute.xlu1 %1495  ;;  %v1885_v23 = vsel %vm1854_vm8, %v1852_v6, %v1494_v49 }
 0x295   : > { %v1886_v1 = vsel %vm1854_vm8, %v1853_v47, %v1496_v59 }
 0x297   : > { %v3307_v58 = vpop.eup %3306  ;;  %v1622_v38 = vpop.permute.xlu0 %1621 }
 0x298   : > { %v3309_v45 = vpop.eup %3308  ;;  %v2815_v9 = vsel %vm2621_vm11, %v3307_v58, %v4702_v27  ;;  %v1918_v22 = vsel %vm1887_vm9, %v1885_v23, %v1622_v38  ;;  %v1624_v56 = vpop.permute.xlu1 %1623 }
 0x299   : > { %2847 = vst [vmem:[%s4766_s25 + $0x8] sm:$0xff] %v2815_v9  ;;  %v2814_v29 = vsel %vm2621_vm11, %v3309_v45, %v4705_v13  ;;  %v1919_v33 = vsel %vm1887_vm9, %v1886_v1, %v1624_v56  ;;  %3192 = vmatprep.mubr.msk.f32.mxu0 %vm1932_vm10, %v1918_v22 }
 0x29a   : > { %2846 = vst [vmem:[%s4766_s25] sm:$0xff] %v2814_v29  ;;  %3193 = vmatmul.mubr.msk.f32.gmra.mrb[30].mxu0 %vm1932_vm10, %v1919_v33 }
 0x29b   : > { %v3202_v27 = vpop.f32.mrb[2].mxu1 }
 0x29c   : > { %v2476_v63 = vadd.f32 %v3202_v27, %v4699_v30  ;;  %v2470_v44 = vpop.f32.mrb[3].mxu1 }
 0x29d   : > { %v2471_v35 = vadd.f32 %v4699_v30, %v2470_v44 }
 0x29e   : > { %v3031_v25 = vmul.f32 -1.442695, %v2476_v63 }
 0x29f   : > { %v3030_v12 = vmul.f32 -1.442695, %v2471_v35 }
 0x2a0   : > { %3310 = vpow2.f32 %v3031_v25 }
 0x2a1   : > { %3312 = vpow2.f32 %v3030_v12  ;;  %v3173_v61 = vpop.f32.mrb[16].mxu0 }
 0x2a2   : > { %v2185_v13 = vadd.f32 %v3173_v61, %v4319_v8  ;;  %v2179_v19 = vpop.f32.mrb[17].mxu0 }
 0x2a3   : > { %v2180_v10 = vadd.f32 %v4319_v8, %v2179_v19 }
 0x2a4   : > { %v2275_v36 = vmax.f32 %v2185_v13, 0.0 }
 0x2a5   : > { %v2274_v28 = vmax.f32 %v2180_v10, 0.0 }
 0x2a7   : > { %3221 = vmatprep.mubr.msk.f32.mxu1 %vm1689_vm3, %v2274_v28 }
 0x2a8   : > { %3222 = vmatmul.mubr.msk.f32.gmra.mrb[16].mxu1 %vm1689_vm3, %v2275_v36 }
 0x2aa   : > { %v3311_v54 = vpop.eup %3310 }
 0x2ab   : > { %v3313_v55 = vpop.eup %3312  ;;  %v2721_v0 = vadd.f32 1.0, %v3311_v54 }
 0x2ac   : > { %v2720_v41 = vadd.f32 1.0, %v3313_v55 }
 0x2ad   : > { %3314 = vrcp.f32 %v2721_v0 }
 0x2ae   : > { %3316 = vrcp.f32 %v2720_v41 }
 0x2b7   : > { %v3315_v14 = vpop.eup %3314 }
 0x2b8   : > { %v3317_v15 = vpop.eup %3316  ;;  %v2817_v3 = vsel %vm2621_vm11, %v3315_v14, %v2476_v63 }
 0x2b9   : > { %2849 = vst [vmem:[%s4766_s25 + $0x18] sm:$0xff] %v2817_v3  ;;  %v2816_v62 = vsel %vm2621_vm11, %v3317_v15, %v2471_v35 }
 0x2ba   : > { %2848 = vst [vmem:[%s4766_s25 + $0x10] sm:$0xff] %v2816_v62 }
 0x2bb   : > { %v3205_v24 = vpop.f32.mrb[4].mxu1 }
 0x2bc   : > { %v2486_v18 = vadd.f32 %v3205_v24, %v4699_v30  ;;  %v2480_v26 = vpop.f32.mrb[5].mxu1 }
 0x2bd   : > { %v2481_v37 = vadd.f32 %v4699_v30, %v2480_v26 }
 0x2be   : > { %v3033_v39 = vmul.f32 -1.442695, %v2486_v18 }
 0x2bf   : > { %v3032_v16 = vmul.f32 -1.442695, %v2481_v37 }
 0x2c0   : > { %3318 = vpow2.f32 %v3033_v39 }
 0x2c1   : > { %3320 = vpow2.f32 %v3032_v16  ;;  %v3176_v57 = vpop.f32.mrb[18].mxu0 }
 0x2c2   : > { %v2195_v34 = vadd.f32 %v3176_v57, %v4319_v8  ;;  %v2189_v32 = vpop.f32.mrb[19].mxu0 }
 0x2c3   : > { %v2190_v50 = vadd.f32 %v4319_v8, %v2189_v32 }
 0x2c4   : > { %v2277_v31 = vmax.f32 %v2195_v34, 0.0 }
 0x2c5   : > { %v2276_v48 = vmax.f32 %v2190_v50, 0.0 }
 0x2c7   : > { %3224 = vmatprep.mubr.msk.f32.mxu1 %vm1689_vm3, %v2276_v48 }
 0x2c8   : > { %3225 = vmatmul.mubr.msk.f32.gmra.mrb[18].mxu1 %vm1689_vm3, %v2277_v31 }
 0x2ca   : > { %v3319_v51 = vpop.eup %3318 }
 0x2cb   : > { %v3321_v60 = vpop.eup %3320  ;;  %v2723_v52 = vadd.f32 1.0, %v3319_v51 }
 0x2cc   : > { %v2722_v43 = vadd.f32 1.0, %v3321_v60 }
 0x2cd   : > { %3322 = vrcp.f32 %v2723_v52 }
 0x2ce   : > { %3324 = vrcp.f32 %v2722_v43 }
 0x2d7   : > { %v3323_v53 = vpop.eup %3322 }
 0x2d8   : > { %v3325_v20 = vpop.eup %3324  ;;  %v2819_v2 = vsel %vm2621_vm11, %v3323_v53, %v2486_v18 }
 0x2d9   : > { %2851 = vst [vmem:[%s4766_s25 + $0x28] sm:$0xff] %v2819_v2  ;;  %v2818_v8 = vsel %vm2621_vm11, %v3325_v20, %v2481_v37 }
 0x2da   : > { %2850 = vst [vmem:[%s4766_s25 + $0x20] sm:$0xff] %v2818_v8 }
 0x2db   : > { %v3208_v11 = vpop.f32.mrb[6].mxu1 }
 0x2dc   : > { %v2496_v46 = vadd.f32 %v3208_v11, %v4699_v30  ;;  %v2490_v4 = vpop.f32.mrb[7].mxu1 }
 0x2dd   : > { %v2491_v49 = vadd.f32 %v4699_v30, %v2490_v4 }
 0x2de   : > { %v3035_v7 = vmul.f32 -1.442695, %v2496_v46 }
 0x2df   : > { %v3034_v21 = vmul.f32 -1.442695, %v2491_v49 }
 0x2e0   : > { %3326 = vpow2.f32 %v3035_v7 }
 0x2e1   : > { %3328 = vpow2.f32 %v3034_v21  ;;  %v3179_v59 = vpop.f32.mrb[20].mxu0 }
 0x2e2   : > { %v2205_v5 = vadd.f32 %v4805_v17, %v3179_v59  ;;  %v2199_v42 = vpop.f32.mrb[21].mxu0 }
 0x2e3   : > { %v2200_v6 = vadd.f32 %v4805_v17, %v2199_v42 }
 0x2e4   : > { %v2279_v47 = vmax.f32 %v2205_v5, 0.0 }
 0x2e5   : > { %v2278_v58 = vmax.f32 %v2200_v6, 0.0 }
 0x2e7   : > { %3227 = vmatprep.mubr.msk.f32.mxu1 %vm1689_vm3, %v2278_v58 }
 0x2e8   : > { %3228 = vmatmul.mubr.msk.f32.gmra.mrb[20].mxu1 %vm1689_vm3, %v2279_v47 }
 0x2ea   : > { %v3327_v23 = vpop.eup %3326 }
 0x2eb   : > { %v3329_v38 = vpop.eup %3328  ;;  %v2725_v45 = vadd.f32 1.0, %v3327_v23 }
 0x2ec   : > { %v2724_v9 = vadd.f32 1.0, %v3329_v38 }
 0x2ed   : > { %3330 = vrcp.f32 %v2725_v45 }
 0x2ee   : > { %3332 = vrcp.f32 %v2724_v9 }
 0x2f7   : > { %v3331_v1 = vpop.eup %3330 }
 0x2f8   : > { %v3333_v22 = vpop.eup %3332  ;;  %v2821_v56 = vsel %vm2621_vm11, %v3331_v1, %v2496_v46 }
 0x2f9   : > { %2853 = vst [vmem:[%s4766_s25 + $0x38] sm:$0xff] %v2821_v56  ;;  %v2820_v29 = vsel %vm2621_vm11, %v3333_v22, %v2491_v49 }
 0x2fa   : > { %2852 = vst [vmem:[%s4766_s25 + $0x30] sm:$0xff] %v2820_v29 }
 0x2fb   : > { %v3211_v33 = vpop.f32.mrb[8].mxu1 }
 0x2fc   : > { %v2506_v27 = vadd.f32 %v3211_v33, %v4699_v30  ;;  %v2500_v63 = vpop.f32.mrb[9].mxu1 }
 0x2fd   : > { %v2501_v44 = vadd.f32 %v4699_v30, %v2500_v63 }
 0x2fe   : > { %v3037_v35 = vmul.f32 -1.442695, %v2506_v27 }
 0x2ff   : > { %v3036_v25 = vmul.f32 -1.442695, %v2501_v44 }
 0x300   : > { %3334 = vpow2.f32 %v3037_v35  ;;  %v3182_v12 = vpop.f32.mrb[22].mxu0 }
 0x301   : > { %3336 = vpow2.f32 %v3036_v25  ;;  %v2215_v61 = vadd.f32 %v4805_v17, %v3182_v12  ;;  %v2209_v13 = vpop.f32.mrb[23].mxu0 }
 0x302   : > { %v2210_v19 = vadd.f32 %v4805_v17, %v2209_v13 }
 0x303   : > { %v2281_v28 = vmax.f32 %v2215_v61, 0.0 }
 0x304   : > { %v2280_v10 = vmax.f32 %v2210_v19, 0.0 }
 0x306   : > { %3230 = vmatprep.mubr.msk.f32.mxu1 %vm1689_vm3, %v2280_v10 }
 0x307   : > { %3231 = vmatmul.mubr.msk.f32.gmra.mrb[22].mxu1 %vm1689_vm3, %v2281_v28 }
 0x30a   : > { %v3335_v36 = vpop.eup %3334 }
 0x30b   : > { %v3337_v54 = vpop.eup %3336  ;;  %v2727_v55 = vadd.f32 1.0, %v3335_v36 }
 0x30c   : > { %v2726_v0 = vadd.f32 1.0, %v3337_v54 }
 0x30d   : > { %3338 = vrcp.f32 %v2727_v55 }
 0x30e   : > { %3340 = vrcp.f32 %v2726_v0 }
 0x317   : > { %v3339_v41 = vpop.eup %3338 }
 0x318   : > { %v3341_v14 = vpop.eup %3340  ;;  %v2823_v15 = vsel %vm2621_vm11, %v3339_v41, %v2506_v27 }
 0x319   : > { %2855 = vst [vmem:[%s4766_s25 + $0x48] sm:$0xff] %v2823_v15  ;;  %v2822_v3 = vsel %vm2621_vm11, %v3341_v14, %v2501_v44 }
 0x31a   : > { %2854 = vst [vmem:[%s4766_s25 + $0x40] sm:$0xff] %v2822_v3 }
 0x31b   : > { %v3214_v62 = vpop.f32.mrb[10].mxu1 }
 0x31c   : > { %v2516_v24 = vadd.f32 %v3214_v62, %v4699_v30  ;;  %v2510_v18 = vpop.f32.mrb[11].mxu1 }
 0x31d   : > { %v2511_v26 = vadd.f32 %v4699_v30, %v2510_v18 }
 0x31e   : > { %v3039_v37 = vmul.f32 -1.442695, %v2516_v24 }
 0x31f   : > { %v3038_v39 = vmul.f32 -1.442695, %v2511_v26 }
 0x320   : > { %3342 = vpow2.f32 %v3039_v37  ;;  %v3185_v16 = vpop.f32.mrb[24].mxu0 }
 0x321   : > { %3344 = vpow2.f32 %v3038_v39  ;;  %v2225_v57 = vadd.f32 %v4805_v17, %v3185_v16  ;;  %v2219_v34 = vpop.f32.mrb[25].mxu0 }
 0x322   : > { %v2220_v32 = vadd.f32 %v4805_v17, %v2219_v34 }
 0x323   : > { %v2283_v48 = vmax.f32 %v2225_v57, 0.0 }
 0x324   : > { %v2282_v50 = vmax.f32 %v2220_v32, 0.0 }
 0x326   : > { %3233 = vmatprep.mubr.msk.f32.mxu1 %vm1689_vm3, %v2282_v50 }
 0x327   : > { %3234 = vmatmul.mubr.msk.f32.gmra.mrb[24].mxu1 %vm1689_vm3, %v2283_v48 }
 0x32a   : > { %v3343_v31 = vpop.eup %3342 }
 0x32b   : > { %v3345_v51 = vpop.eup %3344  ;;  %v2729_v60 = vadd.f32 1.0, %v3343_v31 }
 0x32c   : > { %v2728_v52 = vadd.f32 1.0, %v3345_v51 }
 0x32d   : > { %3346 = vrcp.f32 %v2729_v60 }
 0x32e   : > { %3348 = vrcp.f32 %v2728_v52 }
 0x337   : > { %v3347_v43 = vpop.eup %3346 }
 0x338   : > { %v3349_v53 = vpop.eup %3348  ;;  %v2825_v20 = vsel %vm2621_vm11, %v3347_v43, %v2516_v24 }
 0x339   : > { %2857 = vst [vmem:[%s4766_s25 + $0x58] sm:$0xff] %v2825_v20  ;;  %v2824_v2 = vsel %vm2621_vm11, %v3349_v53, %v2511_v26 }
 0x33a   : > { %2856 = vst [vmem:[%s4766_s25 + $0x50] sm:$0xff] %v2824_v2 }
 0x33b   : > { %v3217_v8 = vpop.f32.mrb[12].mxu1 }
 0x33c   : > { %v2526_v11 = vadd.f32 %v3217_v8, %v4699_v30  ;;  %v2520_v46 = vpop.f32.mrb[13].mxu1 }
 0x33d   : > { %v2521_v4 = vadd.f32 %v4699_v30, %v2520_v46 }
 0x33e   : > { %v3041_v49 = vmul.f32 -1.442695, %v2526_v11 }
 0x33f   : > { %v3040_v7 = vmul.f32 -1.442695, %v2521_v4 }
 0x340   : > { %3350 = vpow2.f32 %v3041_v49  ;;  %v3188_v21 = vpop.f32.mrb[26].mxu0 }
 0x341   : > { %3352 = vpow2.f32 %v3040_v7  ;;  %v2235_v59 = vadd.f32 %v4805_v17, %v3188_v21  ;;  %v2229_v5 = vpop.f32.mrb[27].mxu0 }
 0x342   : > { %v2230_v42 = vadd.f32 %v4805_v17, %v2229_v5 }
 0x343   : > { %v2285_v58 = vmax.f32 %v2235_v59, 0.0 }
 0x344   : > { %v2284_v6 = vmax.f32 %v2230_v42, 0.0 }
 0x346   : > { %3236 = vmatprep.mubr.msk.f32.mxu1 %vm1689_vm3, %v2284_v6 }
 0x347   : > { %3237 = vmatmul.mubr.msk.f32.gmra.mrb[26].mxu1 %vm1689_vm3, %v2285_v58 }
 0x34a   : > { %v3351_v47 = vpop.eup %3350 }
 0x34b   : > { %v3353_v23 = vpop.eup %3352  ;;  %v2731_v38 = vadd.f32 1.0, %v3351_v47 }
 0x34c   : > { %v2730_v45 = vadd.f32 1.0, %v3353_v23 }
 0x34d   : > { %3354 = vrcp.f32 %v2731_v38 }
 0x34e   : > { %3356 = vrcp.f32 %v2730_v45 }
 0x357   : > { %v3355_v9 = vpop.eup %3354 }
 0x358   : > { %v3357_v1 = vpop.eup %3356  ;;  %v2827_v22 = vsel %vm2621_vm11, %v3355_v9, %v2526_v11 }
 0x359   : > { %2859 = vst [vmem:[%s4766_s25 + $0x68] sm:$0xff] %v2827_v22  ;;  %v2826_v56 = vsel %vm2621_vm11, %v3357_v1, %v2521_v4 }
 0x35a   : > { %2858 = vst [vmem:[%s4766_s25 + $0x60] sm:$0xff] %v2826_v56 }
 0x35b   : > { %v3220_v29 = vpop.f32.mrb[14].mxu1 }
 0x35c   : > { %v2536_v33 = vadd.f32 %v3220_v29, %v4699_v30  ;;  %v2530_v27 = vpop.f32.mrb[15].mxu1 }
 0x35d   : > { %v2531_v63 = vadd.f32 %v4699_v30, %v2530_v27 }
 0x35e   : > { %v3043_v44 = vmul.f32 -1.442695, %v2536_v33 }
 0x35f   : > { %v3042_v35 = vmul.f32 -1.442695, %v2531_v63 }
 0x360   : > { %3358 = vpow2.f32 %v3043_v44  ;;  %v3191_v25 = vpop.f32.mrb[28].mxu0 }
 0x361   : > { %3360 = vpow2.f32 %v3042_v35  ;;  %v2245_v12 = vadd.f32 %v4805_v17, %v3191_v25  ;;  %v2239_v61 = vpop.f32.mrb[29].mxu0 }
 0x362   : > { %v2240_v13 = vadd.f32 %v4805_v17, %v2239_v61 }
 0x363   : > { %v2287_v10 = vmax.f32 %v2245_v12, 0.0 }
 0x364   : > { %v2286_v19 = vmax.f32 %v2240_v13, 0.0 }
 0x366   : > { %3239 = vmatprep.mubr.msk.f32.mxu1 %vm1689_vm3, %v2286_v19 }
 0x367   : > { %3240 = vmatmul.mubr.msk.f32.gmra.mrb[28].mxu1 %vm1689_vm3, %v2287_v10 }
 0x36a   : > { %v3359_v28 = vpop.eup %3358 }
 0x36b   : > { %v3361_v36 = vpop.eup %3360  ;;  %v2733_v54 = vadd.f32 1.0, %v3359_v28 }
 0x36c   : > { %v2732_v55 = vadd.f32 1.0, %v3361_v36 }
 0x36d   : > { %3362 = vrcp.f32 %v2733_v54  ;;  %v3194_v0 = vpop.f32.mrb[30].mxu0 }
 0x36e   : > { %3364 = vrcp.f32 %v2732_v55  ;;  %v2255_v41 = vadd.f32 %v4805_v17, %v3194_v0  ;;  %v2249_v14 = vpop.f32.mrb[31].mxu0 }
 0x36f   : > { %v2250_v15 = vadd.f32 %v4805_v17, %v2249_v14 }
 0x370   : > { %v2289_v62 = vmax.f32 %v2255_v41, 0.0 }
 0x371   : > { %v2288_v3 = vmax.f32 %v2250_v15, 0.0 }
 0x373   : > { %3242 = vmatprep.mubr.msk.f32.mxu1 %vm1689_vm3, %v2288_v3 }
 0x374   : > { %3243 = vmatmul.mubr.msk.f32.gmra.mrb[30].mxu1 %vm1689_vm3, %v2289_v62 }
 0x377   : > { %v3363_v24 = vpop.eup %3362 }
 0x378   : > { %v3365_v18 = vpop.eup %3364  ;;  %v2829_v26 = vsel %vm2621_vm11, %v3363_v24, %v2536_v33 }
 0x379   : > { %2861 = vst [vmem:[%s4766_s25 + $0x78] sm:$0xff] %v2829_v26  ;;  %v2828_v37 = vsel %vm2621_vm11, %v3365_v18, %v2531_v63 }
 0x37a   : > { %2860 = vst [vmem:[%s4766_s25 + $0x70] sm:$0xff] %v2828_v37 }
 0x37b   : > { %v3223_v39 = vpop.f32.mrb[16].mxu1 }
 0x37c   : > { %v2546_v16 = vadd.f32 %v3223_v39, %v4699_v30  ;;  %v2540_v17 = vpop.f32.mrb[17].mxu1 }
 0x37d   : > { %v2541_v57 = vadd.f32 %v4699_v30, %v2540_v17 }
 0x37e   : > { %v3045_v34 = vmul.f32 -1.442695, %v2546_v16 }
 0x37f   : > { %v3044_v32 = vmul.f32 -1.442695, %v2541_v57 }
 0x380   : > { %3366 = vpow2.f32 %v3045_v34 }
 0x381   : > { %3368 = vpow2.f32 %v3044_v32 }
 0x38a   : > { %v3367_v50 = vpop.eup %3366 }
 0x38b   : > { %v3369_v48 = vpop.eup %3368  ;;  %v2735_v31 = vadd.f32 1.0, %v3367_v50 }
 0x38c   : > { %v2734_v51 = vadd.f32 1.0, %v3369_v48 }
 0x38d   : > { %3370 = vrcp.f32 %v2735_v31 }
 0x38e   : > { %3372 = vrcp.f32 %v2734_v51 }
 0x397   : > { %v3371_v60 = vpop.eup %3370 }
 0x398   : > { %v3373_v52 = vpop.eup %3372  ;;  %v2831_v43 = vsel %vm2621_vm11, %v3371_v60, %v2546_v16 }
 0x399   : > { %2863 = vst [vmem:[%s4766_s25 + $0x88] sm:$0xff] %v2831_v43  ;;  %v2830_v53 = vsel %vm2621_vm11, %v3373_v52, %v2541_v57 }
 0x39a   : > { %2862 = vst [vmem:[%s4766_s25 + $0x80] sm:$0xff] %v2830_v53 }
 0x39b   : > { %v3226_v20 = vpop.f32.mrb[18].mxu1 }
 0x39c   : > { %v2556_v2 = vadd.f32 %v3226_v20, %v4699_v30  ;;  %v2550_v8 = vpop.f32.mrb[19].mxu1 }
 0x39d   : > { %v2551_v11 = vadd.f32 %v4699_v30, %v2550_v8 }
 0x39e   : > { %v3047_v46 = vmul.f32 -1.442695, %v2556_v2 }
 0x39f   : > { %v3046_v4 = vmul.f32 -1.442695, %v2551_v11 }
 0x3a0   : > { %3374 = vpow2.f32 %v3047_v46 }
 0x3a1   : > { %3376 = vpow2.f32 %v3046_v4 }
 0x3aa   : > { %v3375_v49 = vpop.eup %3374 }
 0x3ab   : > { %v3377_v7 = vpop.eup %3376  ;;  %v2737_v21 = vadd.f32 1.0, %v3375_v49 }
 0x3ac   : > { %v2736_v59 = vadd.f32 1.0, %v3377_v7 }
 0x3ad   : > { %3378 = vrcp.f32 %v2737_v21 }
 0x3ae   : > { %3380 = vrcp.f32 %v2736_v59 }
 0x3b7   : > { %v3379_v5 = vpop.eup %3378 }
 0x3b8   : > { %v3381_v42 = vpop.eup %3380  ;;  %v2833_v6 = vsel %vm2621_vm11, %v3379_v5, %v2556_v2 }
 0x3b9   : > { %2865 = vst [vmem:[%s4766_s25 + $0x98] sm:$0xff] %v2833_v6  ;;  %v2832_v58 = vsel %vm2621_vm11, %v3381_v42, %v2551_v11 }
 0x3ba   : > { %2864 = vst [vmem:[%s4766_s25 + $0x90] sm:$0xff] %v2832_v58 }
 0x3bb   : > { %v3229_v47 = vpop.f32.mrb[20].mxu1 }
 0x3bc   : > { %v2566_v23 = vadd.f32 %v3229_v47, %v4699_v30  ;;  %v2560_v38 = vpop.f32.mrb[21].mxu1 }
 0x3bd   : > { %v2561_v45 = vadd.f32 %v4699_v30, %v2560_v38 }
 0x3be   : > { %v3049_v9 = vmul.f32 -1.442695, %v2566_v23 }
 0x3bf   : > { %v3048_v1 = vmul.f32 -1.442695, %v2561_v45 }
 0x3c0   : > { %3382 = vpow2.f32 %v3049_v9 }
 0x3c1   : > { %3384 = vpow2.f32 %v3048_v1 }
 0x3ca   : > { %v3383_v22 = vpop.eup %3382 }
 0x3cb   : > { %v3385_v56 = vpop.eup %3384  ;;  %v2739_v29 = vadd.f32 1.0, %v3383_v22 }
 0x3cc   : > { %v2738_v33 = vadd.f32 1.0, %v3385_v56 }
 0x3cd   : > { %3386 = vrcp.f32 %v2739_v29 }
 0x3ce   : > { %3388 = vrcp.f32 %v2738_v33 }
 0x3d7   : > { %v3387_v27 = vpop.eup %3386 }
 0x3d8   : > { %v3389_v63 = vpop.eup %3388  ;;  %v2835_v44 = vsel %vm2621_vm11, %v3387_v27, %v2566_v23 }
 0x3d9   : > { %2867 = vst [vmem:[%s4766_s25 + $0xa8] sm:$0xff] %v2835_v44  ;;  %v2834_v35 = vsel %vm2621_vm11, %v3389_v63, %v2561_v45 }
 0x3da   : > { %2866 = vst [vmem:[%s4766_s25 + $0xa0] sm:$0xff] %v2834_v35  ;;  %v3232_v25 = vpop.f32.mrb[22].mxu1 }
 0x3db   : > { %v2576_v12 = vadd.f32 %v3232_v25, %v4699_v30  ;;  %v2570_v61 = vpop.f32.mrb[23].mxu1 }
 0x3dc   : > { %v2571_v13 = vadd.f32 %v4699_v30, %v2570_v61 }
 0x3dd   : > { %v3051_v19 = vmul.f32 -1.442695, %v2576_v12 }
 0x3de   : > { %v3050_v10 = vmul.f32 -1.442695, %v2571_v13 }
 0x3df   : > { %3390 = vpow2.f32 %v3051_v19 }
 0x3e0   : > { %3392 = vpow2.f32 %v3050_v10 }
 0x3e9   : > { %v3391_v28 = vpop.eup %3390 }
 0x3ea   : > { %v3393_v36 = vpop.eup %3392  ;;  %v2741_v54 = vadd.f32 1.0, %v3391_v28 }
 0x3eb   : > { %v2740_v55 = vadd.f32 1.0, %v3393_v36 }
 0x3ec   : > { %3394 = vrcp.f32 %v2741_v54 }
 0x3ed   : > { %3396 = vrcp.f32 %v2740_v55 }
 0x3f6   : > { %v3395_v0 = vpop.eup %3394 }
 0x3f7   : > { %v3397_v41 = vpop.eup %3396  ;;  %v2837_v14 = vsel %vm2621_vm11, %v3395_v0, %v2576_v12 }
 0x3f8   : > { %2869 = vst [vmem:[%s4766_s25 + $0xb8] sm:$0xff] %v2837_v14  ;;  %v2836_v15 = vsel %vm2621_vm11, %v3397_v41, %v2571_v13 }
 0x3f9   : > { %2868 = vst [vmem:[%s4766_s25 + $0xb0] sm:$0xff] %v2836_v15 }
 0x3fa   : > { %v3235_v3 = vpop.f32.mrb[24].mxu1 }
 0x3fb   : > { %v2586_v62 = vadd.f32 %v3235_v3, %v4699_v30  ;;  %v2580_v24 = vpop.f32.mrb[25].mxu1 }
 0x3fc   : > { %v2581_v18 = vadd.f32 %v4699_v30, %v2580_v24 }
 0x3fd   : > { %v3053_v26 = vmul.f32 -1.442695, %v2586_v62 }
 0x3fe   : > { %v3052_v37 = vmul.f32 -1.442695, %v2581_v18 }
 0x3ff   : > { %3398 = vpow2.f32 %v3053_v26 }
 0x400   : > { %3400 = vpow2.f32 %v3052_v37 }
 0x409   : > { %v3399_v39 = vpop.eup %3398 }
 0x40a   : > { %v3401_v16 = vpop.eup %3400  ;;  %v2743_v17 = vadd.f32 1.0, %v3399_v39 }
 0x40b   : > { %v2742_v57 = vadd.f32 1.0, %v3401_v16 }
 0x40c   : > { %3402 = vrcp.f32 %v2743_v17 }
 0x40d   : > { %3404 = vrcp.f32 %v2742_v57 }
 0x416   : > { %v3403_v34 = vpop.eup %3402 }
 0x417   : > { %v3405_v32 = vpop.eup %3404  ;;  %v2839_v50 = vsel %vm2621_vm11, %v3403_v34, %v2586_v62 }
 0x418   : > { %2871 = vst [vmem:[%s4766_s25 + $0xc8] sm:$0xff] %v2839_v50  ;;  %v2838_v48 = vsel %vm2621_vm11, %v3405_v32, %v2581_v18 }
 0x419   : > { %2870 = vst [vmem:[%s4766_s25 + $0xc0] sm:$0xff] %v2838_v48 }
 0x41a   : > { %v3238_v31 = vpop.f32.mrb[26].mxu1 }
 0x41b   : > { %v2596_v51 = vadd.f32 %v3238_v31, %v4699_v30  ;;  %v2590_v60 = vpop.f32.mrb[27].mxu1 }
 0x41c   : > { %v2591_v52 = vadd.f32 %v4699_v30, %v2590_v60 }
 0x41d   : > { %v3055_v43 = vmul.f32 -1.442695, %v2596_v51 }
 0x41e   : > { %v3054_v53 = vmul.f32 -1.442695, %v2591_v52 }
 0x41f   : > { %3406 = vpow2.f32 %v3055_v43 }
 0x420   : > { %3408 = vpow2.f32 %v3054_v53 }
 0x429   : > { %v3407_v20 = vpop.eup %3406 }
 0x42a   : > { %v3409_v2 = vpop.eup %3408  ;;  %v2745_v8 = vadd.f32 1.0, %v3407_v20 }
 0x42b   : > { %v2744_v11 = vadd.f32 1.0, %v3409_v2 }
 0x42c   : > { %3410 = vrcp.f32 %v2745_v8 }
 0x42d   : > { %3412 = vrcp.f32 %v2744_v11 }
 0x436   : > { %v3411_v46 = vpop.eup %3410 }
 0x437   : > { %v3413_v4 = vpop.eup %3412  ;;  %v2841_v49 = vsel %vm2621_vm11, %v3411_v46, %v2596_v51 }
 0x438   : > { %2873 = vst [vmem:[%s4766_s25 + $0xd8] sm:$0xff] %v2841_v49  ;;  %v2840_v7 = vsel %vm2621_vm11, %v3413_v4, %v2591_v52 }
 0x439   : > { %2872 = vst [vmem:[%s4766_s25 + $0xd0] sm:$0xff] %v2840_v7 }
 0x43a   : > { %v3241_v21 = vpop.f32.mrb[28].mxu1 }
 0x43b   : > { %v2606_v59 = vadd.f32 %v3241_v21, %v4699_v30  ;;  %v2600_v5 = vpop.f32.mrb[29].mxu1 }
 0x43c   : > { %v2601_v42 = vadd.f32 %v4699_v30, %v2600_v5 }
 0x43d   : > { %v3057_v6 = vmul.f32 -1.442695, %v2606_v59 }
 0x43e   : > { %v3056_v58 = vmul.f32 -1.442695, %v2601_v42 }
 0x43f   : > { %3414 = vpow2.f32 %v3057_v6 }
 0x440   : > { %3416 = vpow2.f32 %v3056_v58 }
 0x447   : > { %v3244_v47 = vpop.f32.mrb[30].mxu1 }
 0x448   : > { %v2616_v23 = vadd.f32 %v3244_v47, %v4699_v30  ;;  %v2610_v38 = vpop.f32.mrb[31].mxu1 }
 0x449   : > { %v3415_v45 = vpop.eup %3414  ;;  %v2611_v9 = vadd.f32 %v4699_v30, %v2610_v38 }
 0x44a   : > { %v3417_v1 = vpop.eup %3416  ;;  %v2747_v22 = vadd.f32 1.0, %v3415_v45  ;;  %v3059_v56 = vmul.f32 -1.442695, %v2616_v23 }
 0x44b   : > { %v2746_v29 = vadd.f32 1.0, %v3417_v1  ;;  %v3058_v33 = vmul.f32 -1.442695, %v2611_v9 }
 0x44c   : > { %3418 = vrcp.f32 %v2747_v22 }
 0x44d   : > { %3420 = vrcp.f32 %v2746_v29 }
 0x44e   : > { %3422 = vpow2.f32 %v3059_v56 }
 0x44f   : > { %3424 = vpow2.f32 %v3058_v33 }
 0x456   : > { %v3419_v27 = vpop.eup %3418 }
 0x457   : > { %v3421_v63 = vpop.eup %3420  ;;  %v2843_v44 = vsel %vm2621_vm11, %v3419_v27, %v2606_v59 }
 0x458   : > { %v3423_v35 = vpop.eup %3422  ;;  %2875 = vst [vmem:[%s4766_s25 + $0xe8] sm:$0xff] %v2843_v44  ;;  %v2842_v30 = vsel %vm2621_vm11, %v3421_v63, %v2601_v42 }
 0x459   : > { %v3425_v25 = vpop.eup %3424  ;;  %2874 = vst [vmem:[%s4766_s25 + $0xe0] sm:$0xff] %v2842_v30  ;;  %v2749_v12 = vadd.f32 1.0, %v3423_v35 }
 0x45a   : > { %v2748_v61 = vadd.f32 1.0, %v3425_v25 }
 0x45b   : > { %3426 = vrcp.f32 %v2749_v12 }
 0x45c   : > { %3428 = vrcp.f32 %v2748_v61 }
 0x465   : > { %v3427_v13 = vpop.eup %3426 }
 0x466   : > { %v3429_v19 = vpop.eup %3428  ;;  %v2845_v10 = vsel %vm2621_vm11, %v3427_v13, %v2616_v23 }
 0x467   : > { %2877 = vst [vmem:[%s4766_s25 + $0xf8] sm:$0xff] %v2845_v10  ;;  %v2844_v28 = vsel %vm2621_vm11, %v3429_v19, %v2611_v9 }
 0x468   : > { %2876 = vst [vmem:[%s4766_s25 + $0xf0] sm:$0xff] %v2844_v28 }
 0x469   : > { %3444 = shalt.err (!%p3441_p3)
}
 0x46a   : > { %s3445_s12 = scalar_lea.hbm %s4932_s23, 4096  ;;  %s3449_s25 = scalar_lea.hbm %s4991_s5, 8192 }
 0x46b   : > { %p3446_p4 = scmp.ne.s32.totalorder %s4932_s23, %s3445_s12  ;;  %p3450_p9 = scmp.lt.u32.totalorder %s4932_s23, %s4991_s5 }
 0x46c   : > { %p3451_p10 = scmp.lt.u32.totalorder %s3449_s25, %s3445_s12  ;;  %p3453_p12 = scmp.lt.u32.totalorder %s3445_s12, %s4932_s23 }
 0x46d   : > { %p3447_p7 = pnand %p3446_p4, %p3574_p5 }
 0x46e   : > { %p3452_p11 = por %p3451_p10, %p3450_p9 }
 0x46f   : > { %p3448_p8 = pneg %p3447_p7 }
 0x470   : > { %p3454_p13 = por %p3453_p12, %p3452_p11 }
 0x472   : > { %p3455_p0 = pnand %p3454_p13, %p3448_p8 }
 0x474   : > { %3458 = shalt.err (!%p3455_p0)
}
 0x475   : > { %s3505_s8 = smov 128  }
 0x476   : > { %3253 = dma.vmem_to_hbm [thread:$0]  (%p3574_p5), %s4936_s15, 4096, %s4932_s23, %s4944_s22, %s3505_s8, %s3505_s8, %s3496_s10  }
 0x477 PF: > { %p3259_p1 = scmp.ge.s32.totalorder %s3493_s21, 2  ;;  %s2907_s16 = sand.u32 1, %s3481_s18  }
 0x478   : > { %s2908_s17 = scalar_lea.sflag [#allocation4], %s2907_s16 }
 0x479   : > { %p3256_p2 = pnand %p3259_p1, %p3578_p6 }
 0x47b   : > { %3476 = dma.done.wait (!%p3256_p2), %s2908_s17, 4096  }
 0x47c   : > { %3478 = vsyncadd (!%p3256_p2), %s2908_s17, 4294963200  ;;  %p15_p3 = scmp.ge.s32.totalorder %s3561_s24, 4   ;;  %s4994_s18 = smov %s3485_s19 }
 0x47d   : > { %s4995_s19 = smov %s3489_s20  ;;  %s4996_s20 = smov %s3572_s27 }
 0x47e   : > { %s4997_s21 = smov %s3561_s24  ;;  %17 = sbr.rel (!%p15_p3) target bundleno = 3 (0x3), region = 77 }
 0x485   :  { %2913 = vsyncpa [#allocation4], 1 }
 0x486   :  { %2915 = vsyncpa [#allocation4 + $0x1], 1 }

</bundles_post_ra>
